<compile_context>
chip_gen: v5e
topology: v5e:2x2
jax: 0.10.0
libtpu: 0.0.40
codegen_flags: <defaults>
</compile_context>

<pallas_src>
import jax
import jax.numpy as jnp
import numpy as np
from jax import lax
from jax.experimental import pallas as pl
from jax.experimental.pallas import tpu as pltpu

EPS = 1e-5


# ----------------------------------------------------------------------------
# Fused kernel: conv1x1+BN+ReLU -> conv3x3(dil)+BN+ReLU -> conv1x1+BN+res+ReLU
# One grid step = one (batch element, TH-row output block).
# ----------------------------------------------------------------------------
def _bottleneck_kernel(H, W, Cin, planes, Cout, TH, dil):
    d = dil

    def kernel(x_ref, w1_ref, w2_ref, w3_ref,
               s1_ref, b1_ref, s2_ref, b2_ref, s3_ref, b3_ref,
               o_ref, y1_ref):
        r = pl.program_id(1)

        # ---- Stage 1 (once per batch element, r == 0): conv1 + BN1 + ReLU into a
        #      spatially padded VMEM scratch (removes the HBM pad round trip).
        @pl.when(r == 0)
        def _():
            y1_ref[...] = jnp.zeros_like(y1_ref)                 # zero halo border
            x2d = x_ref[...].reshape(H * W, Cin)                  # bf16
            y1 = jnp.dot(x2d, w1_ref[...],
                         preferred_element_type=jnp.float32)      # MXU bf16 -> f32
            y1 = jnp.maximum(y1 * s1_ref[...] + b1_ref[...], 0.0)
            y1 = y1.reshape(H, W, planes)
            zc = jnp.zeros((H, d, planes), jnp.float32)
            # interior rows [d, d+H), zero columns on both sides
            y1_ref[pl.ds(d, H)] = jnp.concatenate([zc, y1, zc], axis=1)

        # ---- Stage 2: 3x3 dilated conv + BN2 + ReLU for this TH-row block.
        rs = pl.multiple_of(r * TH, TH)
        win = y1_ref[pl.ds(rs, TH + 2 * d)]          # (TH+2d, W+2d, planes) f32
        w2 = w2_ref[...]                             # (3, 3, planes, planes) bf16
        acc = jnp.zeros((TH * W, planes), jnp.float32)
        for kh in range(3):
            for kw in range(3):
                patch = lax.slice(win, (kh * d, kw * d, 0),
                                  (kh * d + TH, kw * d + W, planes))
                acc = acc + jnp.dot(
                    patch.reshape(TH * W, planes).astype(jnp.bfloat16),
                    w2[kh, kw], preferred_element_type=jnp.float32)
        y2 = jnp.maximum(acc * s2_ref[...] + b2_ref[...], 0.0)

        # ---- Stage 3: conv3 (1x1) + BN3 + identity residual + ReLU.
        y3 = jnp.dot(y2.astype(jnp.bfloat16), w3_ref[...],
                     preferred_element_type=jnp.float32)
        res = x_ref[:, pl.ds(rs, TH), :, :].reshape(TH * W, Cin).astype(jnp.float32)
        out = jnp.maximum(y3 * s3_ref[...] + b3_ref[...] + res, 0.0)
        o_ref[...] = out.reshape(1, TH, W, Cout).astype(o_ref.dtype)

    return kernel


# ----------------------------------------------------------------------------
# Wrapper
# ----------------------------------------------------------------------------
def _fold_bn(gamma, beta, mean, var):
    scale = gamma / jnp.sqrt(var + EPS)
    bias = beta - mean * scale
    return scale[None, :].astype(jnp.float32), bias[None, :].astype(jnp.float32)


def bottleneck_forward(x_nchw, p, stride=1, dilation=1):
    """Equivalent of Bottleneck.forward with downsample=None (stride must be 1)."""
    if stride != 1:
        raise NotImplementedError(
            "Pallas Bottleneck supports stride=1 only (downsample=None).")

    x = jnp.transpose(x_nchw, (0, 2, 3, 1))          # NCHW -> NHWC (channels on lanes)
    N, H, W, Cin = x.shape
    planes = p["w1"].shape[1]
    Cout = planes * 4
    assert Cin == Cout, "identity residual requires inplanes == planes * expansion"
    d = int(dilation)

    TH = 8 if H % 8 == 0 else H                      # row block: keeps acc in vregs
    n_rb = H // TH

    s1, b1 = _fold_bn(*p["bn1"])
    s2, b2 = _fold_bn(*p["bn2"])
    s3, b3 = _fold_bn(*p["bn3"])
    # bf16 inputs to the MXU on all generations; accumulation / epilogue stay f32.
    xb = x.astype(jnp.bfloat16)
    w1 = p["w1"].astype(jnp.bfloat16)
    w2 = p["w2"].astype(jnp.bfloat16)
    w3 = p["w3"].astype(jnp.bfloat16)

    kernel = _bottleneck_kernel(H, W, Cin, planes, Cout, TH, d)
    vec2 = lambda n, r: (0, 0)

    out = pl.pallas_call(
        kernel,
        out_shape=jax.ShapeDtypeStruct((N, H, W, Cout), jnp.float32),
        grid=(N, n_rb),
        in_specs=[
            # full batch element, resident across the row-block axis (one DMA per n);
            # also supplies the residual rows (no second HBM read of x)
            pl.BlockSpec((1, H, W, Cin), lambda n, r: (n, 0, 0, 0)),
            pl.BlockSpec((Cin, planes), vec2),
            pl.BlockSpec((3, 3, planes, planes), lambda n, r: (0, 0, 0, 0)),
            pl.BlockSpec((planes, Cout), vec2),
            pl.BlockSpec((1, planes), vec2), pl.BlockSpec((1, planes), vec2),
            pl.BlockSpec((1, planes), vec2), pl.BlockSpec((1, planes), vec2),
            pl.BlockSpec((1, Cout), vec2), pl.BlockSpec((1, Cout), vec2),
        ],
        out_specs=pl.BlockSpec((1, TH, W, Cout), lambda n, r: (n, r, 0, 0)),
        scratch_shapes=[pltpu.VMEM((H + 2 * d, W + 2 * d, planes), jnp.float32)],
        compiler_params=pltpu.CompilerParams(
            dimension_semantics=("parallel", "arbitrary"),
            vmem_limit_bytes=32 * 1024 * 1024),
    )(xb, w1, w2, w3, s1, b1, s2, b2, s3, b3)

    return jnp.transpose(out, (0, 3, 1, 2))          # back to NCHW at API boundary


# ----------------------------------------------------------------------------
# Pure-JAX NCHW f32 reference (mirrors the PyTorch module, eval-mode BN)
# ----------------------------------------------------------------------------
def bottleneck_reference(x, raw, stride=1, dilation=1):
    def conv(x, w, stride=1, dil=1, pad=0):
        return lax.conv_general_dilated(
            x, w, (stride, stride), [(pad, pad), (pad, pad)],
            rhs_dilation=(dil, dil),
            dimension_numbers=("NCHW", "OIHW", "NCHW"))

    def bn(x, params):
        g, b, m, v = params
        c = lambda a: a[None, :, None, None]
        return (x - c(m)) / jnp.sqrt(c(v) + EPS) * c(g) + c(b)

    out = jax.nn.relu(bn(conv(x, raw["w1_oihw"]), raw["bn1"]))
    out = jax.nn.relu(bn(conv(out, raw["w2_oihw"], stride, dilation, pad=dilation),
                         raw["bn2"]))
    out = bn(conv(out, raw["w3_oihw"]), raw["bn3"])
    out = out + x
    return jax.nn.relu(out)


# ----------------------------------------------------------------------------
def make_params(key, inplanes, planes):
    ks = jax.random.split(key, 12)

    def bn_params(k0, k1, k2, k3, c):
        gamma = jax.random.uniform(k0, (c,), jnp.float32, 0.5, 1.5)
        beta = 0.1 * jax.random.normal(k1, (c,), jnp.float32)
        mean = 0.1 * jax.random.normal(k2, (c,), jnp.float32)
        var = jax.random.uniform(k3, (c,), jnp.float32, 0.5, 1.5)
        return (gamma, beta, mean, var)

    w1_oihw = 0.1 * jax.random.normal(ks[0], (planes, inplanes, 1, 1), jnp.float32)
    w2_oihw = 0.1 * jax.random.normal(ks[1], (planes, planes, 3, 3), jnp.float32)
    w3_oihw = 0.1 * jax.random.normal(ks[2], (planes * 4, planes, 1, 1), jnp.float32)

    raw = {
        "w1_oihw": w1_oihw, "w2_oihw": w2_oihw, "w3_oihw": w3_oihw,
        "bn1": bn_params(ks[3], ks[4], ks[5], ks[6], planes),
        "bn2": bn_params(ks[7], ks[8], ks[9], ks[10], planes),
        "bn3": bn_params(ks[11], ks[3], ks[7], ks[0], planes * 4),
    }
    kernel_params = {
        "w1": w1_oihw[:, :, 0, 0].T,                    # (Cin, planes)
        "w2": jnp.transpose(w2_oihw, (2, 3, 1, 0)),     # (3, 3, Cin2, Cout2)
        "w3": w3_oihw[:, :, 0, 0].T,                    # (planes, planes*4)
        "bn1": raw["bn1"], "bn2": raw["bn2"], "bn3": raw["bn3"],
    }
    return raw, kernel_params


if __name__ == "__main__":
    # Small shapes: inplanes = planes * expansion so the identity residual is valid.
    inplanes, planes = 16, 4
    N, H, W = 2, 16, 16

    key = jax.random.PRNGKey(0)
    k_x, k_p = jax.random.split(key)
    x = jax.random.normal(k_x, (N, inplanes, H, W), jnp.float32)   # NCHW input
    raw, params = make_params(k_p, inplanes, planes)

    for dilation in (1, 2):
        out = jax.block_until_ready(
            bottleneck_forward(x, params, stride=1, dilation=dilation))
        ref = jax.block_until_ready(
            bottleneck_reference(x, raw, stride=1, dilation=dilation))
        # Tolerance reflects bf16 MXU inputs (f32 accumulation / epilogue) vs the
        # all-f32 reference.
        np.testing.assert_allclose(np.asarray(out), np.asarray(ref),
                                   rtol=5e-2, atol=5e-2)

    print("KERNEL_OK")
</pallas_src>

<mosaic_0001>
module attributes {stable_mosaic.version = 11 : i64} {
  func.func @kernel(%arg0: i32, %arg1: i32, %arg2: memref<1x16x16x16xbf16, #tpu.memory_space<vmem>>, %arg3: memref<16x4xbf16, #tpu.memory_space<vmem>>, %arg4: memref<3x3x4x4xbf16, #tpu.memory_space<vmem>>, %arg5: memref<4x16xbf16, #tpu.memory_space<vmem>>, %arg6: memref<1x4xf32, #tpu.memory_space<vmem>>, %arg7: memref<1x4xf32, #tpu.memory_space<vmem>>, %arg8: memref<1x4xf32, #tpu.memory_space<vmem>>, %arg9: memref<1x4xf32, #tpu.memory_space<vmem>>, %arg10: memref<1x16xf32, #tpu.memory_space<vmem>>, %arg11: memref<1x16xf32, #tpu.memory_space<vmem>>, %arg12: memref<1x8x16x16xf32, #tpu.memory_space<vmem>>, %arg13: memref<18x18x4xf32, #tpu.memory_space<vmem>>) attributes {dimension_semantics = [#tpu.dimension_semantics<parallel>, #tpu.dimension_semantics<arbitrary>], iteration_bounds = array<i64: 2, 2>, scalar_prefetch = 0 : i64, scratch_operands = 1 : i64, tpu.core_type = #tpu.core_type<tc>, window_params = [{transform_indices = @transform_0, window_bounds = array<i64: 1, 16, 16, 16>}, {pipeline_mode = #tpu.pipeline_mode<synchronous>, transform_indices = @transform_1, window_bounds = array<i64: 16, 4>}, {pipeline_mode = #tpu.pipeline_mode<synchronous>, transform_indices = @transform_2, window_bounds = array<i64: 3, 3, 4, 4>}, {pipeline_mode = #tpu.pipeline_mode<synchronous>, transform_indices = @transform_3, window_bounds = array<i64: 4, 16>}, {pipeline_mode = #tpu.pipeline_mode<synchronous>, transform_indices = @transform_4, window_bounds = array<i64: 1, 4>}, {pipeline_mode = #tpu.pipeline_mode<synchronous>, transform_indices = @transform_5, window_bounds = array<i64: 1, 4>}, {pipeline_mode = #tpu.pipeline_mode<synchronous>, transform_indices = @transform_6, window_bounds = array<i64: 1, 4>}, {pipeline_mode = #tpu.pipeline_mode<synchronous>, transform_indices = @transform_7, window_bounds = array<i64: 1, 4>}, {pipeline_mode = #tpu.pipeline_mode<synchronous>, transform_indices = @transform_8, window_bounds = array<i64: 1, 16>}, {pipeline_mode = #tpu.pipeline_mode<synchronous>, transform_indices = @transform_9, window_bounds = array<i64: 1, 16>}, {transform_indices = @transform_10, window_bounds = array<i64: 1, 8, 16, 16>}]} {
    %c0_i32 = arith.constant 0 : i32
    %0 = arith.cmpi eq, %arg1, %c0_i32 : i32
    %1 = arith.extui %0 : i1 to i32
    %c0_i32_0 = arith.constant 0 : i32
    %2 = arith.cmpi ne, %1, %c0_i32_0 : i32
    scf.if %2 {
      %cst_35 = arith.constant 0.000000e+00 : f32
      %98 = vector.broadcast %cst_35 : f32 to vector<18x18x4xf32>
      %c0_36 = arith.constant 0 : index
      %c0_37 = arith.constant 0 : index
      %c0_38 = arith.constant 0 : index
      %99 = vector.load %arg13[%c0_36, %c0_37, %c0_38] : memref<18x18x4xf32, #tpu.memory_space<vmem>>, vector<18x18x4xf32>
      tpu.vector_store %arg13[%c0_36, %c0_37, %c0_38], %98 {strides = array<i32>} : memref<18x18x4xf32, #tpu.memory_space<vmem>>, vector<18x18x4xf32>,
      %c0_39 = arith.constant 0 : index
      %c0_40 = arith.constant 0 : index
      %c0_41 = arith.constant 0 : index
      %c0_42 = arith.constant 0 : index
      %100 = vector.load %arg2[%c0_39, %c0_40, %c0_41, %c0_42] : memref<1x16x16x16xbf16, #tpu.memory_space<vmem>>, vector<1x16x16x16xbf16>
      %101 = vector.shape_cast %100 : vector<1x16x16x16xbf16> to vector<256x16xbf16>
      %c0_43 = arith.constant 0 : index
      %c0_44 = arith.constant 0 : index
      %102 = vector.load %arg3[%c0_43, %c0_44] : memref<16x4xbf16, #tpu.memory_space<vmem>>, vector<16x4xbf16>
      %cst_45 = arith.constant dense<0.000000e+00> : vector<256x4xf32>
      %103 = tpu.matmul %101, %102, %cst_45 {dimension_numbers = #tpu.dot_dimension_numbers<[1], [0], [0], [1], [0, 0, 1, 1], [], []>} : vector<256x16xbf16>, vector<16x4xbf16>, vector<256x4xf32> -> vector<256x4xf32>
      %c0_46 = arith.constant 0 : index
      %c0_47 = arith.constant 0 : index
      %104 = vector.load %arg6[%c0_46, %c0_47] : memref<1x4xf32, #tpu.memory_space<vmem>>, vector<1x4xf32>
      %105 = vector.broadcast %104 : vector<1x4xf32> to vector<256x4xf32>
      %106 = arith.mulf %103, %105 : vector<256x4xf32>
      %c0_48 = arith.constant 0 : index
      %c0_49 = arith.constant 0 : index
      %107 = vector.load %arg7[%c0_48, %c0_49] : memref<1x4xf32, #tpu.memory_space<vmem>>, vector<1x4xf32>
      %108 = vector.broadcast %107 : vector<1x4xf32> to vector<256x4xf32>
      %109 = arith.addf %106, %108 : vector<256x4xf32>
      %cst_50 = arith.constant 0.000000e+00 : f32
      %110 = vector.broadcast %cst_50 : f32 to vector<256x4xf32>
      %111 = arith.maximumf %109, %110 : vector<256x4xf32>
      %112 = vector.shape_cast %111 : vector<256x4xf32> to vector<16x16x4xf32>
      %cst_51 = arith.constant 0.000000e+00 : f32
      %113 = vector.broadcast %cst_51 : f32 to vector<16x1x4xf32>
      %114 = tpu.concatenate %113, %112, %113 in 1 : vector<16x1x4xf32>, vector<16x16x4xf32>, vector<16x1x4xf32> -> vector<16x18x4xf32>
      %c1 = arith.constant 1 : index
      %c0_52 = arith.constant 0 : index
      %c0_53 = arith.constant 0 : index
      %115 = vector.load %arg13[%c1, %c0_52, %c0_53] : memref<18x18x4xf32, #tpu.memory_space<vmem>>, vector<16x18x4xf32>
      tpu.vector_store %arg13[%c1, %c0_52, %c0_53], %114 {strides = array<i32>} : memref<18x18x4xf32, #tpu.memory_space<vmem>>, vector<16x18x4xf32>,
    } else {
    }
    %c8_i32 = arith.constant 8 : i32
    %3 = arith.muli %arg1, %c8_i32 : i32
    %4 = tpu.assume_multiple %3, 8 : i32
    %5 = arith.index_cast %4 : i32 to index
    %c0 = arith.constant 0 : index
    %c0_1 = arith.constant 0 : index
    %6 = vector.load %arg13[%5, %c0, %c0_1] : memref<18x18x4xf32, #tpu.memory_space<vmem>>, vector<10x18x4xf32>
    %c0_2 = arith.constant 0 : index
    %c0_3 = arith.constant 0 : index
    %c0_4 = arith.constant 0 : index
    %c0_5 = arith.constant 0 : index
    %7 = vector.load %arg4[%c0_2, %c0_3, %c0_4, %c0_5] : memref<3x3x4x4xbf16, #tpu.memory_space<vmem>>, vector<3x3x4x4xbf16>
    %cst = arith.constant 0.000000e+00 : f32
    %8 = vector.broadcast %cst : f32 to vector<128x4xf32>
    %9 = vector.extract_strided_slice %6 {offsets = [0, 0, 0], sizes = [8, 16, 4], strides = [1, 1, 1]} : vector<10x18x4xf32> to vector<8x16x4xf32>
    %10 = vector.shape_cast %9 : vector<8x16x4xf32> to vector<128x4xf32>
    %11 = arith.truncf %10 : vector<128x4xf32> to vector<128x4xbf16>
    %12 = vector.extract_strided_slice %7 {offsets = [0, 0, 0, 0], sizes = [1, 1, 4, 4], strides = [1, 1, 1, 1]} : vector<3x3x4x4xbf16> to vector<1x1x4x4xbf16>
    %13 = vector.shape_cast %12 : vector<1x1x4x4xbf16> to vector<4x4xbf16>
    %cst_6 = arith.constant dense<0.000000e+00> : vector<128x4xf32>
    %14 = tpu.matmul %11, %13, %cst_6 {dimension_numbers = #tpu.dot_dimension_numbers<[1], [0], [0], [1], [0, 0, 1, 1], [], []>} : vector<128x4xbf16>, vector<4x4xbf16>, vector<128x4xf32> -> vector<128x4xf32>
    %15 = arith.addf %8, %14 : vector<128x4xf32>
    %16 = vector.extract_strided_slice %6 {offsets = [0, 1, 0], sizes = [8, 16, 4], strides = [1, 1, 1]} : vector<10x18x4xf32> to vector<8x16x4xf32>
    %17 = vector.shape_cast %16 : vector<8x16x4xf32> to vector<128x4xf32>
    %18 = arith.truncf %17 : vector<128x4xf32> to vector<128x4xbf16>
    %19 = vector.extract_strided_slice %7 {offsets = [0, 1, 0, 0], sizes = [1, 1, 4, 4], strides = [1, 1, 1, 1]} : vector<3x3x4x4xbf16> to vector<1x1x4x4xbf16>
    %20 = vector.shape_cast %19 : vector<1x1x4x4xbf16> to vector<4x4xbf16>
    %cst_7 = arith.constant dense<0.000000e+00> : vector<128x4xf32>
    %21 = tpu.matmul %18, %20, %cst_7 {dimension_numbers = #tpu.dot_dimension_numbers<[1], [0], [0], [1], [0, 0, 1, 1], [], []>} : vector<128x4xbf16>, vector<4x4xbf16>, vector<128x4xf32> -> vector<128x4xf32>
    %22 = arith.addf %15, %21 : vector<128x4xf32>
    %23 = vector.extract_strided_slice %6 {offsets = [0, 2, 0], sizes = [8, 16, 4], strides = [1, 1, 1]} : vector<10x18x4xf32> to vector<8x16x4xf32>
    %24 = vector.shape_cast %23 : vector<8x16x4xf32> to vector<128x4xf32>
    %25 = arith.truncf %24 : vector<128x4xf32> to vector<128x4xbf16>
    %26 = vector.extract_strided_slice %7 {offsets = [0, 2, 0, 0], sizes = [1, 1, 4, 4], strides = [1, 1, 1, 1]} : vector<3x3x4x4xbf16> to vector<1x1x4x4xbf16>
    %27 = vector.shape_cast %26 : vector<1x1x4x4xbf16> to vector<4x4xbf16>
    %cst_8 = arith.constant dense<0.000000e+00> : vector<128x4xf32>
    %28 = tpu.matmul %25, %27, %cst_8 {dimension_numbers = #tpu.dot_dimension_numbers<[1], [0], [0], [1], [0, 0, 1, 1], [], []>} : vector<128x4xbf16>, vector<4x4xbf16>, vector<128x4xf32> -> vector<128x4xf32>
    %29 = arith.addf %22, %28 : vector<128x4xf32>
    %30 = vector.extract_strided_slice %6 {offsets = [1, 0, 0], sizes = [8, 16, 4], strides = [1, 1, 1]} : vector<10x18x4xf32> to vector<8x16x4xf32>
    %31 = vector.shape_cast %30 : vector<8x16x4xf32> to vector<128x4xf32>
    %32 = arith.truncf %31 : vector<128x4xf32> to vector<128x4xbf16>
    %33 = vector.extract_strided_slice %7 {offsets = [1, 0, 0, 0], sizes = [1, 1, 4, 4], strides = [1, 1, 1, 1]} : vector<3x3x4x4xbf16> to vector<1x1x4x4xbf16>
    %34 = vector.shape_cast %33 : vector<1x1x4x4xbf16> to vector<4x4xbf16>
    %cst_9 = arith.constant dense<0.000000e+00> : vector<128x4xf32>
    %35 = tpu.matmul %32, %34, %cst_9 {dimension_numbers = #tpu.dot_dimension_numbers<[1], [0], [0], [1], [0, 0, 1, 1], [], []>} : vector<128x4xbf16>, vector<4x4xbf16>, vector<128x4xf32> -> vector<128x4xf32>
    %36 = arith.addf %29, %35 : vector<128x4xf32>
    %37 = vector.extract_strided_slice %6 {offsets = [1, 1, 0], sizes = [8, 16, 4], strides = [1, 1, 1]} : vector<10x18x4xf32> to vector<8x16x4xf32>
    %38 = vector.shape_cast %37 : vector<8x16x4xf32> to vector<128x4xf32>
    %39 = arith.truncf %38 : vector<128x4xf32> to vector<128x4xbf16>
    %40 = vector.extract_strided_slice %7 {offsets = [1, 1, 0, 0], sizes = [1, 1, 4, 4], strides = [1, 1, 1, 1]} : vector<3x3x4x4xbf16> to vector<1x1x4x4xbf16>
    %41 = vector.shape_cast %40 : vector<1x1x4x4xbf16> to vector<4x4xbf16>
    %cst_10 = arith.constant dense<0.000000e+00> : vector<128x4xf32>
    %42 = tpu.matmul %39, %41, %cst_10 {dimension_numbers = #tpu.dot_dimension_numbers<[1], [0], [0], [1], [0, 0, 1, 1], [], []>} : vector<128x4xbf16>, vector<4x4xbf16>, vector<128x4xf32> -> vector<128x4xf32>
    %43 = arith.addf %36, %42 : vector<128x4xf32>
    %44 = vector.extract_strided_slice %6 {offsets = [1, 2, 0], sizes = [8, 16, 4], strides = [1, 1, 1]} : vector<10x18x4xf32> to vector<8x16x4xf32>
    %45 = vector.shape_cast %44 : vector<8x16x4xf32> to vector<128x4xf32>
    %46 = arith.truncf %45 : vector<128x4xf32> to vector<128x4xbf16>
    %47 = vector.extract_strided_slice %7 {offsets = [1, 2, 0, 0], sizes = [1, 1, 4, 4], strides = [1, 1, 1, 1]} : vector<3x3x4x4xbf16> to vector<1x1x4x4xbf16>
    %48 = vector.shape_cast %47 : vector<1x1x4x4xbf16> to vector<4x4xbf16>
    %cst_11 = arith.constant dense<0.000000e+00> : vector<128x4xf32>
    %49 = tpu.matmul %46, %48, %cst_11 {dimension_numbers = #tpu.dot_dimension_numbers<[1], [0], [0], [1], [0, 0, 1, 1], [], []>} : vector<128x4xbf16>, vector<4x4xbf16>, vector<128x4xf32> -> vector<128x4xf32>
    %50 = arith.addf %43, %49 : vector<128x4xf32>
    %51 = vector.extract_strided_slice %6 {offsets = [2, 0, 0], sizes = [8, 16, 4], strides = [1, 1, 1]} : vector<10x18x4xf32> to vector<8x16x4xf32>
    %52 = vector.shape_cast %51 : vector<8x16x4xf32> to vector<128x4xf32>
    %53 = arith.truncf %52 : vector<128x4xf32> to vector<128x4xbf16>
    %54 = vector.extract_strided_slice %7 {offsets = [2, 0, 0, 0], sizes = [1, 1, 4, 4], strides = [1, 1, 1, 1]} : vector<3x3x4x4xbf16> to vector<1x1x4x4xbf16>
    %55 = vector.shape_cast %54 : vector<1x1x4x4xbf16> to vector<4x4xbf16>
    %cst_12 = arith.constant dense<0.000000e+00> : vector<128x4xf32>
    %56 = tpu.matmul %53, %55, %cst_12 {dimension_numbers = #tpu.dot_dimension_numbers<[1], [0], [0], [1], [0, 0, 1, 1], [], []>} : vector<128x4xbf16>, vector<4x4xbf16>, vector<128x4xf32> -> vector<128x4xf32>
    %57 = arith.addf %50, %56 : vector<128x4xf32>
    %58 = vector.extract_strided_slice %6 {offsets = [2, 1, 0], sizes = [8, 16, 4], strides = [1, 1, 1]} : vector<10x18x4xf32> to vector<8x16x4xf32>
    %59 = vector.shape_cast %58 : vector<8x16x4xf32> to vector<128x4xf32>
    %60 = arith.truncf %59 : vector<128x4xf32> to vector<128x4xbf16>
    %61 = vector.extract_strided_slice %7 {offsets = [2, 1, 0, 0], sizes = [1, 1, 4, 4], strides = [1, 1, 1, 1]} : vector<3x3x4x4xbf16> to vector<1x1x4x4xbf16>
    %62 = vector.shape_cast %61 : vector<1x1x4x4xbf16> to vector<4x4xbf16>
    %cst_13 = arith.constant dense<0.000000e+00> : vector<128x4xf32>
    %63 = tpu.matmul %60, %62, %cst_13 {dimension_numbers = #tpu.dot_dimension_numbers<[1], [0], [0], [1], [0, 0, 1, 1], [], []>} : vector<128x4xbf16>, vector<4x4xbf16>, vector<128x4xf32> -> vector<128x4xf32>
    %64 = arith.addf %57, %63 : vector<128x4xf32>
    %65 = vector.extract_strided_slice %6 {offsets = [2, 2, 0], sizes = [8, 16, 4], strides = [1, 1, 1]} : vector<10x18x4xf32> to vector<8x16x4xf32>
    %66 = vector.shape_cast %65 : vector<8x16x4xf32> to vector<128x4xf32>
    %67 = arith.truncf %66 : vector<128x4xf32> to vector<128x4xbf16>
    %68 = vector.extract_strided_slice %7 {offsets = [2, 2, 0, 0], sizes = [1, 1, 4, 4], strides = [1, 1, 1, 1]} : vector<3x3x4x4xbf16> to vector<1x1x4x4xbf16>
    %69 = vector.shape_cast %68 : vector<1x1x4x4xbf16> to vector<4x4xbf16>
    %cst_14 = arith.constant dense<0.000000e+00> : vector<128x4xf32>
    %70 = tpu.matmul %67, %69, %cst_14 {dimension_numbers = #tpu.dot_dimension_numbers<[1], [0], [0], [1], [0, 0, 1, 1], [], []>} : vector<128x4xbf16>, vector<4x4xbf16>, vector<128x4xf32> -> vector<128x4xf32>
    %71 = arith.addf %64, %70 : vector<128x4xf32>
    %c0_15 = arith.constant 0 : index
    %c0_16 = arith.constant 0 : index
    %72 = vector.load %arg8[%c0_15, %c0_16] : memref<1x4xf32, #tpu.memory_space<vmem>>, vector<1x4xf32>
    %73 = vector.broadcast %72 : vector<1x4xf32> to vector<128x4xf32>
    %74 = arith.mulf %71, %73 : vector<128x4xf32>
    %c0_17 = arith.constant 0 : index
    %c0_18 = arith.constant 0 : index
    %75 = vector.load %arg9[%c0_17, %c0_18] : memref<1x4xf32, #tpu.memory_space<vmem>>, vector<1x4xf32>
    %76 = vector.broadcast %75 : vector<1x4xf32> to vector<128x4xf32>
    %77 = arith.addf %74, %76 : vector<128x4xf32>
    %cst_19 = arith.constant 0.000000e+00 : f32
    %78 = vector.broadcast %cst_19 : f32 to vector<128x4xf32>
    %79 = arith.maximumf %77, %78 : vector<128x4xf32>
    %80 = arith.truncf %79 : vector<128x4xf32> to vector<128x4xbf16>
    %c0_20 = arith.constant 0 : index
    %c0_21 = arith.constant 0 : index
    %81 = vector.load %arg5[%c0_20, %c0_21] : memref<4x16xbf16, #tpu.memory_space<vmem>>, vector<4x16xbf16>
    %cst_22 = arith.constant dense<0.000000e+00> : vector<128x16xf32>
    %82 = tpu.matmul %80, %81, %cst_22 {dimension_numbers = #tpu.dot_dimension_numbers<[1], [0], [0], [1], [0, 0, 1, 1], [], []>} : vector<128x4xbf16>, vector<4x16xbf16>, vector<128x16xf32> -> vector<128x16xf32>
    %c0_23 = arith.constant 0 : index
    %83 = arith.index_cast %4 : i32 to index
    %c0_24 = arith.constant 0 : index
    %c0_25 = arith.constant 0 : index
    %84 = vector.load %arg2[%c0_23, %83, %c0_24, %c0_25] : memref<1x16x16x16xbf16, #tpu.memory_space<vmem>>, vector<1x8x16x16xbf16>
    %85 = vector.shape_cast %84 : vector<1x8x16x16xbf16> to vector<128x16xbf16>
    %86 = arith.extf %85 : vector<128x16xbf16> to vector<128x16xf32>
    %c0_26 = arith.constant 0 : index
    %c0_27 = arith.constant 0 : index
    %87 = vector.load %arg10[%c0_26, %c0_27] : memref<1x16xf32, #tpu.memory_space<vmem>>, vector<1x16xf32>
    %88 = vector.broadcast %87 : vector<1x16xf32> to vector<128x16xf32>
    %89 = arith.mulf %82, %88 : vector<128x16xf32>
    %c0_28 = arith.constant 0 : index
    %c0_29 = arith.constant 0 : index
    %90 = vector.load %arg11[%c0_28, %c0_29] : memref<1x16xf32, #tpu.memory_space<vmem>>, vector<1x16xf32>
    %91 = vector.broadcast %90 : vector<1x16xf32> to vector<128x16xf32>
    %92 = arith.addf %89, %91 : vector<128x16xf32>
    %93 = arith.addf %92, %86 : vector<128x16xf32>
    %cst_30 = arith.constant 0.000000e+00 : f32
    %94 = vector.broadcast %cst_30 : f32 to vector<128x16xf32>
    %95 = arith.maximumf %93, %94 : vector<128x16xf32>
    %96 = vector.shape_cast %95 : vector<128x16xf32> to vector<1x8x16x16xf32>
    %c0_31 = arith.constant 0 : index
    %c0_32 = arith.constant 0 : index
    %c0_33 = arith.constant 0 : index
    %c0_34 = arith.constant 0 : index
    %97 = vector.load %arg12[%c0_31, %c0_32, %c0_33, %c0_34] : memref<1x8x16x16xf32, #tpu.memory_space<vmem>>, vector<1x8x16x16xf32>
    tpu.vector_store %arg12[%c0_31, %c0_32, %c0_33, %c0_34], %96 {strides = array<i32>} : memref<1x8x16x16xf32, #tpu.memory_space<vmem>>, vector<1x8x16x16xf32>,
    return
  }
  func.func @transform_0(%arg0: i32, %arg1: i32) -> (i32, i32, i32, i32) {
    %c0_i32 = arith.constant 0 : i32
    %c0_i32_0 = arith.constant 0 : i32
    %c0_i32_1 = arith.constant 0 : i32
    %c0_i32_2 = arith.constant 0 : i32
    return %arg0, %c0_i32, %c0_i32_0, %c0_i32_1 : i32, i32, i32, i32
  }
  func.func @transform_1(%arg0: i32, %arg1: i32) -> (i32, i32) {
    %c0_i32 = arith.constant 0 : i32
    %c0_i32_0 = arith.constant 0 : i32
    %c0_i32_1 = arith.constant 0 : i32
    return %c0_i32, %c0_i32_0 : i32, i32
  }
  func.func @transform_2(%arg0: i32, %arg1: i32) -> (i32, i32, i32, i32) {
    %c0_i32 = arith.constant 0 : i32
    %c0_i32_0 = arith.constant 0 : i32
    %c0_i32_1 = arith.constant 0 : i32
    %c0_i32_2 = arith.constant 0 : i32
    %c0_i32_3 = arith.constant 0 : i32
    return %c0_i32, %c0_i32_0, %c0_i32_1, %c0_i32_2 : i32, i32, i32, i32
  }
  func.func @transform_3(%arg0: i32, %arg1: i32) -> (i32, i32) {
    %c0_i32 = arith.constant 0 : i32
    %c0_i32_0 = arith.constant 0 : i32
    %c0_i32_1 = arith.constant 0 : i32
    return %c0_i32, %c0_i32_0 : i32, i32
  }
  func.func @transform_4(%arg0: i32, %arg1: i32) -> (i32, i32) {
    %c0_i32 = arith.constant 0 : i32
    %c0_i32_0 = arith.constant 0 : i32
    %c0_i32_1 = arith.constant 0 : i32
    return %c0_i32, %c0_i32_0 : i32, i32
  }
  func.func @transform_5(%arg0: i32, %arg1: i32) -> (i32, i32) {
    %c0_i32 = arith.constant 0 : i32
    %c0_i32_0 = arith.constant 0 : i32
    %c0_i32_1 = arith.constant 0 : i32
    return %c0_i32, %c0_i32_0 : i32, i32
  }
  func.func @transform_6(%arg0: i32, %arg1: i32) -> (i32, i32) {
    %c0_i32 = arith.constant 0 : i32
    %c0_i32_0 = arith.constant 0 : i32
    %c0_i32_1 = arith.constant 0 : i32
    return %c0_i32, %c0_i32_0 : i32, i32
  }
  func.func @transform_7(%arg0: i32, %arg1: i32) -> (i32, i32) {
    %c0_i32 = arith.constant 0 : i32
    %c0_i32_0 = arith.constant 0 : i32
    %c0_i32_1 = arith.constant 0 : i32
    return %c0_i32, %c0_i32_0 : i32, i32
  }
  func.func @transform_8(%arg0: i32, %arg1: i32) -> (i32, i32) {
    %c0_i32 = arith.constant 0 : i32
    %c0_i32_0 = arith.constant 0 : i32
    %c0_i32_1 = arith.constant 0 : i32
    return %c0_i32, %c0_i32_0 : i32, i32
  }
  func.func @transform_9(%arg0: i32, %arg1: i32) -> (i32, i32) {
    %c0_i32 = arith.constant 0 : i32
    %c0_i32_0 = arith.constant 0 : i32
    %c0_i32_1 = arith.constant 0 : i32
    return %c0_i32, %c0_i32_0 : i32, i32
  }
  func.func @transform_10(%arg0: i32, %arg1: i32) -> (i32, i32, i32, i32) {
    %c0_i32 = arith.constant 0 : i32
    %c0_i32_0 = arith.constant 0 : i32
    %c0_i32_1 = arith.constant 0 : i32
    return %arg0, %arg1, %c0_i32, %c0_i32_0 : i32, i32, i32, i32
  }
}

</mosaic_0001>

<bundles_post_ra>
// kernel: tpu_custom_call.1
= control target key start
LH: loop header
LB: loop body
LE: loop exit
PB: predicated region body
PF: predicated region fallthrough
CT: control target
= control target key end

     0   :  { %s4107_s0 = inlined_call_operand.hbm [shape: bf16[2,16,16,16], index: 0, kind: input, shape index: {}]   ;;  %s4108_s1 = inlined_call_operand.vmem [shape: bf16[16,4], index: 1, kind: input, shape index: {}]   ;;  %s4109_s2 = inlined_call_operand.hbm [shape: bf16[3,3,4,4], index: 2, kind: input, shape index: {}]   ;;  %s4110_s3 = inlined_call_operand.vmem [shape: bf16[4,16], index: 3, kind: input, shape index: {}]   ;;  %s4111_s4 = inlined_call_operand.vmem [shape: f32[1,4], index: 4, kind: input, shape index: {}]   ;;  %s4112_s5 = inlined_call_operand.vmem [shape: f32[1,4], index: 5, kind: input, shape index: {}]   ;;  %s4113_s6 = inlined_call_operand.vmem [shape: f32[1,4], index: 6, kind: input, shape index: {}]   ;;  %s4114_s7 = inlined_call_operand.vmem [shape: f32[1,4], index: 7, kind: input, shape index: {}]   ;;  %s4115_s8 = inlined_call_operand.vmem [shape: f32[1,16], index: 8, kind: input, shape index: {}]   ;;  %s4116_s9 = inlined_call_operand.vmem [shape: f32[1,16], index: 9, kind: input, shape index: {}]   ;;  %s4117_s10 = inlined_call_operand.hbm [shape: f32[2,16,16,16], index: 10, kind: output, shape index: {}]  }
   0x1   :  { %4126 = sst [smem:[#allocation19_spill]] %s4109_s2 }
   0x2   :  { %4127 = sst [smem:[#allocation20_spill]] %s4110_s3 }
   0x3   :  { %4128 = sst [smem:[#allocation21_spill]] %s4112_s5 }
   0x4   :  { %4129 = sst [smem:[#allocation22_spill]] %s4113_s6 }
   0x5   :  { %4130 = sst [smem:[#allocation23_spill]] %s4114_s7 }
   0x6   :  { %4131 = sst [smem:[#allocation24_spill]] %s4115_s8 }
   0x7   :  { %4132 = sst [smem:[#allocation25_spill]] %s4116_s9 }
   0x8   :  { %4133 = sst [smem:[#allocation26_spill]] %s4117_s10 }
   0x9   :  { %15 = vsyncpa [#allocation4], 0 }
   0xa   :  { %17 = vsyncpa [#allocation4 + $0x1], 0 }
   0xb   :  { %18 = vsyncpa [#allocation7], 0 }
   0xc   :  { %19 = vsyncpa [#allocation5], 0 }
   0xd   :  { %21 = vsyncpa [#allocation5 + $0x1], 0  ;;  %s2976_s13 = smov 0   ;;  %s2978_s14 = smov 0  }
   0xe   :  { %s2980_s15 = smov 0   ;;  %s2982_s16 = smov 0  }
   0xf   :  { %s2984_s17 = smov 0   ;;  %s2986_s18 = smov 0  }
  0x10   :  { %s2988_s19 = smov 0   ;;  %s2990_s20 = smov 0  }
  0x11   :  { %s2992_s21 = smov 0   ;;  %s2994_s22 = smov 0  }
  0x12   :  { %s2996_s23 = smov 0  }
  0x13 LB: > { %4134 = sst [smem:[#allocation12_spill]] %s2871_s13  ;;  %s2346_s24 = sadd.s32 4294967295, %s2911_s23   ;;  %s2911_s23 = sphi %s2996_s23, %s27_s23   ;;  %s2907_s22 = sphi %s2994_s22, %s4170_s22   ;;  %s2903_s21 = sphi %s2992_s21, %s4161_s21   ;;  %s2899_s20 = sphi %s2990_s20, %s4169_s20   ;;  %s2895_s19 = sphi %s2988_s19, %s4160_s19   ;;  %s2891_s18 = sphi %s2986_s18, %s4168_s18   ;;  %s2887_s17 = sphi %s2984_s17, %s4167_s17   ;;  %s2883_s16 = sphi %s2982_s16, %s4166_s16   ;;  %s2879_s15 = sphi %s2980_s15, %s4165_s15   ;;  %s2875_s14 = sphi %s2978_s14, %s4164_s14   ;;  %s2871_s13 = sphi %s2976_s13, %s4163_s13  }
  0x14   : > { %4135 = sst [smem:[#allocation13_spill]] %s2899_s20  ;;  %s2347_s25 = sadd.s32 4294967294, %s2911_s23  }
  0x15   : > { %4136 = sst [smem:[#allocation14_spill]] %s2903_s21  ;;  %p59_p0 = scmp.ne.s32.totalorder %s2887_s17, %s2883_s16 }
  0x16   : > { %p3032_p1 = scmp.eq.s32.totalorder %s2346_s24, 0  ;;  %p273_p2 = scmp.ne.s32.totalorder %s2879_s15, %s2875_s14 }
  0x17   : > { %p274_p3 = scmp.eq.s32.totalorder %s2346_s24, 3  ;;  %p279_p5 = scmp.ne.s32.totalorder %s2875_s14, %s2871_s13 }
  0x18   : > { %p3040_p4 = por %p3032_p1, %p59_p0  ;;  %p280_p7 = scmp.eq.s32.totalorder %s2347_s25, 3 }
  0x19   : > { %p3046_p6 = por %p274_p3, %p273_p2  ;;  %p2348_p8 = scmp.ge.s32.totalorder %s2911_s23, 1 }
  0x1a   : > { %p287_p9 = scmp.lt.s32.totalorder %s2911_s23, 5  ;;  %p3052_p10 = por %p280_p7, %p279_p5 }
  0x1b   : > { %s4139_s28 = scalar_select %p3046_p6, 1, 0 }
  0x1c   : > { %s4141_s29 = scalar_select %p3052_p10, 1, 0 }
  0x1d   : > { %4140 = sst [smem:[#allocation15_spill]] %s4139_s28  ;;  %p3056_p11 = pnand %p2348_p8, %p287_p9 }
  0x1e   : > { %4142 = sst [smem:[#allocation16_spill]] %s4141_s29  ;;  %s2913_s24 = smov [#allocation6]  }
  0x1f   : > { %s4144_s2 = sld [smem:[#allocation19_spill]]  ;;  %p2607_p12 = pneg %p3056_p11 }
  0x20   : > { %s303_s25 = sshll.u32 %s2913_s24, 4  ;;  %s2914_s29 = smov 32   ;;  %s304_s25 = int_to_ptr.vmem [resolvable:$true] %s303_s25 }
  0x21   : > { %p2608_p13 = pnand %p2607_p12, %p3032_p1  ;;  %s2915_s13 = smov 2  }
  0x22   : > { %s36_s11 = sadd.s32 1, %s2903_s21  ;;  %s39_s12 = sadd.s32 1, %s2907_s22 }
  0x23   : > { %p37_p0 = scmp.ge.s32.totalorder %s36_s11, 2  ;;  %p53_p2 = scmp.ne.s32.totalorder %s2891_s18, %s2887_s17 }
  0x24   : > { %p54_p3 = scmp.eq.s32.totalorder %s2911_s23, 0  ;;  %p2620_p8 = scmp.lt.s32.totalorder %s2911_s23, 4 }
  0x25   : > { %s301_s16 = sshll.u32 %s4144_s2, 4  ;;  %s46_s2 = sadd.s32 1, %s2891_s18  ;;  %s302_s16 = int_to_ptr.hbm [resolvable:$true] %s301_s16 }
  0x26   : > { %2610 = dma.hbm_to_vmem [thread:$0]  (!%p2608_p13), %s302_s16, 288, %s304_s25, [#allocation7], %s2914_s29, %s2914_s29, %s2915_s13  }
  0x27   : > { %s4172_s11 = smov (%p37_p0, %s36_s11), 0  ;;  %s4174_s12 = smov (!%p37_p0, %s39_s12), %s2907_s22 }
  0x28   : > { %4145 = sst [smem:[#allocation17_spill]] %s4172_s11  ;;  %p3076_p5 = por %p54_p3, %p53_p2 }
  0x29   : > { %s259_s28 = ssub.s32 %s2903_s21, %s4172_s11  ;;  %p41_p7 = scmp.ge.s32.totalorder %s4174_s12, 2 }
  0x2a   : > { %s263_s13 = sadd.s32 1, %s2879_s15  ;;  %s338_s29 = sand.u32 1, %s2891_s18  }
  0x2b   : > { %s4176_s12 = smov (%p41_p7, %s4174_s12), 0  ;;  %s2351_s16 = sshll.u32 %s338_s29, 7 }
  0x2c   : > { %4147 = sst [smem:[#allocation18_spill]] %s4176_s12  ;;  %s43_s25 = ssub.s32 %s2907_s22, %s4176_s12 }
  0x2d   : > { %p44_p9 = scmp.eq.s32.totalorder %s43_s25, 0  ;;  %s260_s10 = sor.u32 %s259_s28, %s43_s25 }
  0x2e   : > { %p261_p12 = scmp.eq.s32.totalorder %s260_s10, 0  ;;  %s2534_s20 = sshll.u32 %s2907_s22, 7 }
  0x2f   : > { %s3091_s9 = scalar_select %p44_p9, %s2891_s18, %s46_s2  }
  0x30   : > { %s3094_s8 = scalar_select %p261_p12, %s2879_s15, %s263_s13  }
  0x31   : > { %s347_s7 = scalar_lea.hbm %s4107_s0, %s2534_s20  ;;  %s342_s6 = scalar_lea.vmem [#allocation3], %s2351_s16 }
  0x32   : > { %s350_s3 = sshll.u32 %s342_s6, 4  ;;  %s348_s5 = sshll.u32 %s347_s7, 4  ;;  %s351_s3 = int_to_ptr.vmem [resolvable:$true] %s350_s3  ;;  %s349_s5 = int_to_ptr.hbm [resolvable:$true] %s348_s5 }
  0x33   : > { %p2612_p13 = pnand %p2620_p8, %p3076_p5  ;;  %s339_s12 = scalar_lea.sflag [#allocation4], %s338_s29 }
  0x34   : > { %s2916_s28 = smov 64   ;;  %s2917_s10 = smov 4  }
  0x35   : > { %2614 = dma.hbm_to_vmem [thread:$0]  (!%p2612_p13), %s349_s5, 2048, %s351_s3, %s339_s12, %s2916_s28, %s2916_s28, %s2917_s10  }
  0x36   : > { %362 = sbr.rel (%p3056_p11) target bundleno = 891 (0x37b), region = 60  ;;  %s364_s2 = sand.u32 (!%p3056_p11), 1, %s2887_s17  }
  0x37   : > { %s2355_s21 = sshll.u32 (!%p3056_p11), %s364_s2, 7  ;;  %s365_s20 = scalar_lea.sflag (!%p3056_p11), [#allocation4], %s364_s2 }
  0x38   : > { %s3106_s11 = scalar_lea.vmem (!%p3056_p11), [#allocation3], %s2355_s21 }
  0x3b   : > { %2858 = dma.done.wait (%p3040_p4), %s365_s20, 2048  }
  0x3c   : > { %2860 = vsyncadd (%p3040_p4), %s365_s20, 4294965248 }
  0x3d   : > { %2862 = dma.done.wait (%p3032_p1), [#allocation7], 288  }
  0x3e   : > { %2864 = vsyncadd (%p3032_p1), [#allocation7], 4294967008  ;;  %s408_s3 = sand.u32 1, %s2875_s14   ;;  %p2358_p11 = scmp.ne.s32.totalorder %s2895_s19, 0 }
  0x3f   : > { %s2357_s5 = sshll.u32 %s408_s3, 7  ;;  %s4148_s13 = sld [smem:[#allocation21_spill]] (!%p2358_p11) }
  0x40   : > { %s3119_s6 = scalar_lea.vmem [#allocation8], %s2357_s5  ;;  %416 = sbr.rel (%p2358_p11) target bundleno = 275 (0x113), region = 72 }
  0x45   : > { %v2551_v0 = vld [vmem:[%s4108_s1] sm:$0xff]  ;;  %v2535_v1 = vld [vmem:[%s3106_s11] sm:$0xff]  ;;  %vm593_vm0 = vcmask 130048   ;;  %v2536_v5 = vld [vmem:[%s3106_s11 + $0x8] sm:$0xff]  ;;  %vm417_vm1 = vcmask 31744   ;;  %v2918_v9 = vmov 0.0  }
  0x46   : > { %v2539_v2 = vld [vmem:[%s3106_s11 + $0x20] sm:$0xff]  ;;  %649 = vmatpush.bf16.msra.mxu0 %v2551_v0  ;;  %2594 = vmatpush.bf16.msra.mxu1 %v2551_v0  ;;  %v2540_v6 = vld [vmem:[%s3106_s11 + $0x28] sm:$0xff]  ;;  %418 = vst.msk [vmem:[#allocation2] sm:$0xff] %vm417_vm1, %v2918_v9  ;;  %v2537_v10 = vld [vmem:[%s3106_s11 + $0x10] sm:$0xff]  ;;  %vm420_vm2 = vcmask 25600   ;;  %vm867_vm3 = vcmask 1040384  }
  0x47   : > { %v2543_v3 = vld [vmem:[%s3106_s11 + $0x40] sm:$0xff]  ;;  %2595 = vmatpush.bf16.msra.mxu2 %v2551_v0  ;;  %2596 = vmatpush.bf16.msra.mxu3 %v2551_v0  ;;  %v2544_v7 = vld [vmem:[%s3106_s11 + $0x48] sm:$0xff]  ;;  %419 = vst.msk [vmem:[#allocation2 + $0x8] sm:$0xff] %vm417_vm1, %v2918_v9  ;;  %v2541_v11 = vld [vmem:[%s3106_s11 + $0x30] sm:$0xff] }
  0x48   : > { %v2547_v4 = vld [vmem:[%s3106_s11 + $0x60] sm:$0xff]  ;;  %v2548_v8 = vld [vmem:[%s3106_s11 + $0x68] sm:$0xff]  ;;  %422 = vst.msk [vmem:[#allocation2 + $0x18] sm:$0xff] %vm417_vm1, %v2918_v9  ;;  %v2545_v12 = vld [vmem:[%s3106_s11 + $0x50] sm:$0xff] }
  0x49   : > { %2427 = vmatmul.msk.bf16.vlgmr.msra.gmra.mxu0 %vm593_vm0, %v2535_v1  ;;  %2431 = vmatmul.msk.bf16.vlgmr.msra.gmra.mxu1 %vm593_vm0, %v2539_v2  ;;  %470 = vst.msk [vmem:[#allocation2 + $0x198] sm:$0xff] %vm417_vm1, %v2918_v9  ;;  %v2549_v13 = vld [vmem:[%s3106_s11 + $0x70] sm:$0xff]  ;;  %v2538_v14 = vld [vmem:[%s3106_s11 + $0x18] sm:$0xff] }
  0x4a   : > { %2435 = vmatmul.msk.bf16.vlgmr.msra.gmra.mxu2 %vm593_vm0, %v2543_v3  ;;  %2439 = vmatmul.msk.bf16.vlgmr.msra.gmra.mxu3 %vm593_vm0, %v2547_v4  ;;  %471 = vst.msk [vmem:[#allocation2 + $0x1a0] sm:$0xff] %vm417_vm1, %v2918_v9  ;;  %v2542_v15 = vld [vmem:[%s3106_s11 + $0x38] sm:$0xff]  ;;  %v3252_v18 = vld [vmem:[%s4111_s4] ss:$0 sm:$0xff] }
  0x4b   : > { %423 = vst.msk [vmem:[#allocation2 + $0x20] sm:$0xff] %vm417_vm1, %v2918_v9  ;;  %v2546_v16 = vld [vmem:[%s3106_s11 + $0x58] sm:$0xff]  ;;  %v3261_v19 = vld [vmem:[%s4148_s13] ss:$0 sm:$0xff] }
  0x4c   : > { %425 = vst.msk [vmem:[#allocation2 + $0x30] sm:$0xff] %vm417_vm1, %v2918_v9  ;;  %v2550_v17 = vld [vmem:[%s3106_s11 + $0x78] sm:$0xff] }
  0x4d   : > { %426 = vst.msk [vmem:[#allocation2 + $0x38] sm:$0xff] %vm417_vm1, %v2918_v9 }
  0x4e   : > { %428 = vst.msk [vmem:[#allocation2 + $0x48] sm:$0xff] %vm417_vm1, %v2918_v9 }
  0x4f   : > { %429 = vst.msk [vmem:[#allocation2 + $0x50] sm:$0xff] %vm417_vm1, %v2918_v9 }
  0x50   : > { %431 = vst.msk [vmem:[#allocation2 + $0x60] sm:$0xff] %vm417_vm1, %v2918_v9 }
  0x51   : > { %432 = vst.msk [vmem:[#allocation2 + $0x68] sm:$0xff] %vm417_vm1, %v2918_v9 }
  0x52   : > { %434 = vst.msk [vmem:[#allocation2 + $0x78] sm:$0xff] %vm417_vm1, %v2918_v9 }
  0x53   : > { %435 = vst.msk [vmem:[#allocation2 + $0x80] sm:$0xff] %vm417_vm1, %v2918_v9 }
  0x54   : > { %437 = vst.msk [vmem:[#allocation2 + $0x90] sm:$0xff] %vm417_vm1, %v2918_v9 }
  0x55   : > { %438 = vst.msk [vmem:[#allocation2 + $0x98] sm:$0xff] %vm417_vm1, %v2918_v9 }
  0x56   : > { %440 = vst.msk [vmem:[#allocation2 + $0xa8] sm:$0xff] %vm417_vm1, %v2918_v9 }
  0x57   : > { %441 = vst.msk [vmem:[#allocation2 + $0xb0] sm:$0xff] %vm417_vm1, %v2918_v9 }
  0x58   : > { %443 = vst.msk [vmem:[#allocation2 + $0xc0] sm:$0xff] %vm417_vm1, %v2918_v9 }
  0x59   : > { %2428 = vmatmul.msk.bf16.gmra.mxu0 %vm593_vm0, %v2536_v5  ;;  %2432 = vmatmul.msk.bf16.gmra.mxu1 %vm593_vm0, %v2540_v6  ;;  %444 = vst.msk [vmem:[#allocation2 + $0xc8] sm:$0xff] %vm417_vm1, %v2918_v9 }
  0x5a   : > { %2436 = vmatmul.msk.bf16.gmra.mxu2 %vm593_vm0, %v2544_v7  ;;  %2440 = vmatmul.msk.bf16.gmra.mxu3 %vm593_vm0, %v2548_v8  ;;  %446 = vst.msk [vmem:[#allocation2 + $0xd8] sm:$0xff] %vm417_vm1, %v2918_v9 }
  0x5b   : > { %447 = vst.msk [vmem:[#allocation2 + $0xe0] sm:$0xff] %vm417_vm1, %v2918_v9 }
  0x5c   : > { %449 = vst.msk [vmem:[#allocation2 + $0xf0] sm:$0xff] %vm417_vm1, %v2918_v9 }
  0x5d   : > { %450 = vst.msk [vmem:[#allocation2 + $0xf8] sm:$0xff] %vm417_vm1, %v2918_v9 }
  0x5e   : > { %452 = vst.msk [vmem:[#allocation2 + $0x108] sm:$0xff] %vm417_vm1, %v2918_v9 }
  0x5f   : > { %453 = vst.msk [vmem:[#allocation2 + $0x110] sm:$0xff] %vm417_vm1, %v2918_v9 }
  0x60   : > { %455 = vst.msk [vmem:[#allocation2 + $0x120] sm:$0xff] %vm417_vm1, %v2918_v9 }
  0x61   : > { %456 = vst.msk [vmem:[#allocation2 + $0x128] sm:$0xff] %vm417_vm1, %v2918_v9 }
  0x62   : > { %458 = vst.msk [vmem:[#allocation2 + $0x138] sm:$0xff] %vm417_vm1, %v2918_v9 }
  0x63   : > { %459 = vst.msk [vmem:[#allocation2 + $0x140] sm:$0xff] %vm417_vm1, %v2918_v9 }
  0x64   : > { %461 = vst.msk [vmem:[#allocation2 + $0x150] sm:$0xff] %vm417_vm1, %v2918_v9 }
  0x65   : > { %462 = vst.msk [vmem:[#allocation2 + $0x158] sm:$0xff] %vm417_vm1, %v2918_v9 }
  0x66   : > { %464 = vst.msk [vmem:[#allocation2 + $0x168] sm:$0xff] %vm417_vm1, %v2918_v9 }
  0x67   : > { %465 = vst.msk [vmem:[#allocation2 + $0x170] sm:$0xff] %vm417_vm1, %v2918_v9 }
  0x68   : > { %467 = vst.msk [vmem:[#allocation2 + $0x180] sm:$0xff] %vm417_vm1, %v2918_v9 }
  0x69   : > { %2429 = vmatmul.msk.bf16.gmra.mxu0 %vm593_vm0, %v2537_v10  ;;  %2433 = vmatmul.msk.bf16.gmra.mxu1 %vm593_vm0, %v2541_v11  ;;  %468 = vst.msk [vmem:[#allocation2 + $0x188] sm:$0xff] %vm417_vm1, %v2918_v9 }
  0x6a   : > { %2437 = vmatmul.msk.bf16.gmra.mxu2 %vm593_vm0, %v2545_v12  ;;  %2441 = vmatmul.msk.bf16.gmra.mxu3 %vm593_vm0, %v2549_v13  ;;  %421 = vst.msk [vmem:[#allocation2 + $0x10] sm:$0x3] %vm420_vm2, %v2918_v9 }
  0x6b   : > { %424 = vst.msk [vmem:[#allocation2 + $0x28] sm:$0x3] %vm420_vm2, %v2918_v9 }
  0x6c   : > { %472 = vst.msk [vmem:[#allocation2 + $0x1a8] sm:$0x3] %vm420_vm2, %v2918_v9 }
  0x6d   : > { %427 = vst.msk [vmem:[#allocation2 + $0x40] sm:$0x3] %vm420_vm2, %v2918_v9 }
  0x6e   : > { %430 = vst.msk [vmem:[#allocation2 + $0x58] sm:$0x3] %vm420_vm2, %v2918_v9 }
  0x6f   : > { %433 = vst.msk [vmem:[#allocation2 + $0x70] sm:$0x3] %vm420_vm2, %v2918_v9 }
  0x70   : > { %436 = vst.msk [vmem:[#allocation2 + $0x88] sm:$0x3] %vm420_vm2, %v2918_v9 }
  0x71   : > { %439 = vst.msk [vmem:[#allocation2 + $0xa0] sm:$0x3] %vm420_vm2, %v2918_v9 }
  0x72   : > { %442 = vst.msk [vmem:[#allocation2 + $0xb8] sm:$0x3] %vm420_vm2, %v2918_v9 }
  0x73   : > { %445 = vst.msk [vmem:[#allocation2 + $0xd0] sm:$0x3] %vm420_vm2, %v2918_v9 }
  0x74   : > { %448 = vst.msk [vmem:[#allocation2 + $0xe8] sm:$0x3] %vm420_vm2, %v2918_v9 }
  0x75   : > { %451 = vst.msk [vmem:[#allocation2 + $0x100] sm:$0x3] %vm420_vm2, %v2918_v9 }
  0x76   : > { %454 = vst.msk [vmem:[#allocation2 + $0x118] sm:$0x3] %vm420_vm2, %v2918_v9 }
  0x77   : > { %457 = vst.msk [vmem:[#allocation2 + $0x130] sm:$0x3] %vm420_vm2, %v2918_v9 }
  0x78   : > { %460 = vst.msk [vmem:[#allocation2 + $0x148] sm:$0x3] %vm420_vm2, %v2918_v9 }
  0x79   : > { %2430 = vmatmul.msk.bf16.gmra.mxu0 %vm593_vm0, %v2538_v14  ;;  %2434 = vmatmul.msk.bf16.gmra.mxu1 %vm593_vm0, %v2542_v15  ;;  %463 = vst.msk [vmem:[#allocation2 + $0x160] sm:$0x3] %vm420_vm2, %v2918_v9 }
  0x7a   : > { %2438 = vmatmul.msk.bf16.gmra.mxu2 %vm593_vm0, %v2546_v16  ;;  %2442 = vmatmul.msk.bf16.gmra.mxu3 %vm593_vm0, %v2550_v17  ;;  %466 = vst.msk [vmem:[#allocation2 + $0x178] sm:$0x3] %vm420_vm2, %v2918_v9 }
  0x7b   : > { %469 = vst.msk [vmem:[#allocation2 + $0x190] sm:$0x3] %vm420_vm2, %v2918_v9 }
  0xc6   : > { %v651_v20 = vpop.f32.mrf.mxu0  ;;  %v671_v21 = vpop.f32.mrf.mxu1 }
  0xc7   : > { %v735_v22 = vmul.f32 %v3252_v18, %v651_v20  ;;  %v743_v23 = vmul.f32 %v3252_v18, %v671_v21 }
  0xc9   : > { %v771_v24 = vadd.f32 %v3261_v19, %v735_v22  ;;  %v779_v25 = vadd.f32 %v3261_v19, %v743_v23 }
  0xcb   : > { %v803_v26 = vmax.f32 %v771_v24, 0.0  ;;  %v811_v27 = vmax.f32 %v779_v25, 0.0 }
  0xcd   : > { %v868_v28 = vrot.slane %v803_v26, 7  ;;  %v880_v29 = vrot.slane %v811_v27, 7  ;;  %v691_v30 = vpop.f32.mrf.mxu2  ;;  %v711_v31 = vpop.f32.mrf.mxu3 }
  0xce   : > { %v751_v32 = vmul.f32 %v3252_v18, %v691_v30  ;;  %v759_v33 = vmul.f32 %v3252_v18, %v711_v31  ;;  %v653_v34 = vpop.f32.mrf.mxu0  ;;  %v673_v35 = vpop.f32.mrf.mxu1 }
  0xcf   : > { %v964_v36 = vsel %vm867_vm3, 0.0, %v868_v28  ;;  %v968_v37 = vsel %vm867_vm3, 0.0, %v880_v29  ;;  %v736_v38 = vmul.f32 %v3252_v18, %v653_v34  ;;  %v744_v39 = vmul.f32 %v3252_v18, %v673_v35 }
  0xd0   : > { %997 = vst.msk [vmem:[#allocation2 + $0x18] sm:$0xff] %vm417_vm1, %v964_v36  ;;  %v787_v40 = vadd.f32 %v3261_v19, %v751_v32  ;;  %v795_v41 = vadd.f32 %v3261_v19, %v759_v33 }
  0xd1   : > { %1009 = vst.msk [vmem:[#allocation2 + $0x78] sm:$0xff] %vm417_vm1, %v968_v37  ;;  %v772_v42 = vadd.f32 %v3261_v19, %v736_v38  ;;  %v780_v43 = vadd.f32 %v3261_v19, %v744_v39 }
  0xd2   : > { %v819_v44 = vmax.f32 %v787_v40, 0.0  ;;  %v827_v45 = vmax.f32 %v795_v41, 0.0 }
  0xd3   : > { %v804_v46 = vmax.f32 %v772_v42, 0.0  ;;  %v812_v47 = vmax.f32 %v780_v43, 0.0 }
  0xd4   : > { %v892_v48 = vrot.slane %v819_v44, 7  ;;  %v904_v49 = vrot.slane %v827_v45, 7 }
  0xd5   : > { %v869_v50 = vrot.slane %v804_v46, 7  ;;  %v881_v51 = vrot.slane %v812_v47, 7  ;;  %v693_v52 = vpop.f32.mrf.mxu2  ;;  %v713_v53 = vpop.f32.mrf.mxu3 }
  0xd6   : > { %v972_v54 = vsel %vm867_vm3, 0.0, %v892_v48  ;;  %v976_v55 = vsel %vm867_vm3, 0.0, %v904_v49  ;;  %v752_v56 = vmul.f32 %v3252_v18, %v693_v52  ;;  %v760_v57 = vmul.f32 %v3252_v18, %v713_v53  ;;  %v656_v58 = vpop.f32.mrf.mxu0  ;;  %v676_v59 = vpop.f32.mrf.mxu1 }
  0xd7   : > { %1021 = vst.msk [vmem:[#allocation2 + $0xd8] sm:$0xff] %vm417_vm1, %v972_v54  ;;  %v870_v60 = vsel %vm867_vm3, %v868_v28, %v869_v50  ;;  %v980_v61 = vsel %vm867_vm3, %v869_v50, 0.0  ;;  %v882_v62 = vsel %vm867_vm3, %v880_v29, %v881_v51  ;;  %v737_v1 = vmul.f32 %v3252_v18, %v656_v58 }
  0xd8   : > { %1033 = vst.msk [vmem:[#allocation2 + $0x138] sm:$0xff] %vm417_vm1, %v976_v55  ;;  %v788_v63 = vadd.f32 %v3261_v19, %v752_v56  ;;  %v796_v0 = vadd.f32 %v3261_v19, %v760_v57  ;;  %v745_v2 = vmul.f32 %v3252_v18, %v676_v59  ;;  %v984_v3 = vsel %vm867_vm3, %v881_v51, 0.0 }
  0xd9   : > { %998 = vst.msk [vmem:[#allocation2 + $0x20] sm:$0xff] %vm417_vm1, %v870_v60  ;;  %v773_v6 = vadd.f32 %v3261_v19, %v737_v1 }
  0xda   : > { %999 = vst.msk [vmem:[#allocation2 + $0x28] sm:$0x3] %vm420_vm2, %v980_v61  ;;  %v820_v4 = vmax.f32 %v788_v63, 0.0  ;;  %v828_v5 = vmax.f32 %v796_v0, 0.0  ;;  %v781_v7 = vadd.f32 %v3261_v19, %v745_v2 }
  0xdb   : > { %1010 = vst.msk [vmem:[#allocation2 + $0x80] sm:$0xff] %vm417_vm1, %v882_v62  ;;  %v805_v10 = vmax.f32 %v773_v6, 0.0 }
  0xdc   : > { %1011 = vst.msk [vmem:[#allocation2 + $0x88] sm:$0x3] %vm420_vm2, %v984_v3  ;;  %v893_v8 = vrot.slane %v820_v4, 7  ;;  %v905_v9 = vrot.slane %v828_v5, 7  ;;  %v813_v11 = vmax.f32 %v781_v7, 0.0 }
  0xdd   : > { %v696_v12 = vpop.f32.mrf.mxu2  ;;  %v716_v13 = vpop.f32.mrf.mxu3  ;;  %v871_v22 = vrot.slane %v805_v10, 7 }
  0xde   : > { %v894_v14 = vsel %vm867_vm3, %v892_v48, %v893_v8  ;;  %v988_v15 = vsel %vm867_vm3, %v893_v8, 0.0  ;;  %v906_v16 = vsel %vm867_vm3, %v904_v49, %v905_v9  ;;  %v992_v17 = vsel %vm867_vm3, %v905_v9, 0.0  ;;  %v658_v20 = vpop.f32.mrf.mxu0  ;;  %v678_v21 = vpop.f32.mrf.mxu1 }
  0xdf   : > { %1022 = vst.msk [vmem:[#allocation2 + $0xe0] sm:$0xff] %vm417_vm1, %v894_v14  ;;  %v883_v23 = vrot.slane %v813_v11, 7  ;;  %v753_v24 = vmul.f32 %v3252_v18, %v696_v12  ;;  %v761_v25 = vmul.f32 %v3252_v18, %v716_v13  ;;  %v738_v26 = vmul.f32 %v3252_v18, %v658_v20 }
  0xe0   : > { %1023 = vst.msk [vmem:[#allocation2 + $0xe8] sm:$0x3] %vm420_vm2, %v988_v15  ;;  %v746_v27 = vmul.f32 %v3252_v18, %v678_v21  ;;  %v965_v28 = vsel %vm867_vm3, 0.0, %v871_v22 }
  0xe1   : > { %1034 = vst.msk [vmem:[#allocation2 + $0x140] sm:$0xff] %vm417_vm1, %v906_v16  ;;  %v969_v29 = vsel %vm867_vm3, 0.0, %v883_v23  ;;  %v789_v30 = vadd.f32 %v3261_v19, %v753_v24  ;;  %v797_v31 = vadd.f32 %v3261_v19, %v761_v25  ;;  %v774_v32 = vadd.f32 %v3261_v19, %v738_v26 }
  0xe2   : > { %1035 = vst.msk [vmem:[#allocation2 + $0x148] sm:$0x3] %vm420_vm2, %v992_v17  ;;  %v782_v33 = vadd.f32 %v3261_v19, %v746_v27 }
  0xe3   : > { %1000 = vst.msk [vmem:[#allocation2 + $0x30] sm:$0xff] %vm417_vm1, %v965_v28  ;;  %v821_v34 = vmax.f32 %v789_v30, 0.0  ;;  %v829_v35 = vmax.f32 %v797_v31, 0.0  ;;  %v806_v36 = vmax.f32 %v774_v32, 0.0 }
  0xe4   : > { %1012 = vst.msk [vmem:[#allocation2 + $0x90] sm:$0xff] %vm417_vm1, %v969_v29  ;;  %v814_v37 = vmax.f32 %v782_v33, 0.0 }
  0xe5   : > { %v895_v38 = vrot.slane %v821_v34, 7  ;;  %v907_v39 = vrot.slane %v829_v35, 7  ;;  %v698_v40 = vpop.f32.mrf.mxu2  ;;  %v718_v41 = vpop.f32.mrf.mxu3  ;;  %v872_v42 = vrot.slane %v806_v36, 7 }
  0xe6   : > { %v884_v43 = vrot.slane %v814_v37, 7  ;;  %v754_v44 = vmul.f32 %v3252_v18, %v698_v40  ;;  %v762_v45 = vmul.f32 %v3252_v18, %v718_v41  ;;  %v661_v46 = vpop.f32.mrf.mxu0  ;;  %v681_v47 = vpop.f32.mrf.mxu1 }
  0xe7   : > { %v973_v48 = vsel %vm867_vm3, 0.0, %v895_v38  ;;  %v977_v49 = vsel %vm867_vm3, 0.0, %v907_v39  ;;  %v739_v50 = vmul.f32 %v3252_v18, %v661_v46  ;;  %v747_v51 = vmul.f32 %v3252_v18, %v681_v47 }
  0xe8   : > { %1024 = vst.msk [vmem:[#allocation2 + $0xf0] sm:$0xff] %vm417_vm1, %v973_v48  ;;  %v873_v52 = vsel %vm867_vm3, %v871_v22, %v872_v42  ;;  %v981_v53 = vsel %vm867_vm3, %v872_v42, 0.0  ;;  %v885_v54 = vsel %vm867_vm3, %v883_v23, %v884_v43  ;;  %v790_v55 = vadd.f32 %v3261_v19, %v754_v44 }
  0xe9   : > { %1036 = vst.msk [vmem:[#allocation2 + $0x150] sm:$0xff] %vm417_vm1, %v977_v49  ;;  %v798_v56 = vadd.f32 %v3261_v19, %v762_v45  ;;  %v775_v57 = vadd.f32 %v3261_v19, %v739_v50  ;;  %v783_v58 = vadd.f32 %v3261_v19, %v747_v51  ;;  %v985_v59 = vsel %vm867_vm3, %v884_v43, 0.0 }
  0xea   : > { %1001 = vst.msk [vmem:[#allocation2 + $0x38] sm:$0xff] %vm417_vm1, %v873_v52  ;;  %v822_v60 = vmax.f32 %v790_v55, 0.0 }
  0xeb   : > { %1002 = vst.msk [vmem:[#allocation2 + $0x40] sm:$0x3] %vm420_vm2, %v981_v53  ;;  %v830_v61 = vmax.f32 %v798_v56, 0.0  ;;  %v807_v62 = vmax.f32 %v775_v57, 0.0  ;;  %v815_v63 = vmax.f32 %v783_v58, 0.0 }
  0xec   : > { %1013 = vst.msk [vmem:[#allocation2 + $0x98] sm:$0xff] %vm417_vm1, %v885_v54  ;;  %v896_v0 = vrot.slane %v822_v60, 7 }
  0xed   : > { %1014 = vst.msk [vmem:[#allocation2 + $0xa0] sm:$0x3] %vm420_vm2, %v985_v59  ;;  %v908_v1 = vrot.slane %v830_v61, 7  ;;  %v874_v2 = vrot.slane %v807_v62, 7  ;;  %v701_v3 = vpop.f32.mrf.mxu2  ;;  %v721_v4 = vpop.f32.mrf.mxu3  ;;  %v886_v5 = vrot.slane %v815_v63, 7 }
  0xee   : > { %v755_v6 = vmul.f32 %v3252_v18, %v701_v3  ;;  %v763_v7 = vmul.f32 %v3252_v18, %v721_v4  ;;  %v663_v8 = vpop.f32.mrf.mxu0  ;;  %v683_v9 = vpop.f32.mrf.mxu1  ;;  %v897_v10 = vsel %vm867_vm3, %v895_v38, %v896_v0  ;;  %v989_v11 = vsel %vm867_vm3, %v896_v0, 0.0 }
  0xef   : > { %v909_v12 = vsel %vm867_vm3, %v907_v39, %v908_v1  ;;  %1025 = vst.msk [vmem:[#allocation2 + $0xf8] sm:$0xff] %vm417_vm1, %v897_v10  ;;  %v993_v13 = vsel %vm867_vm3, %v908_v1, 0.0  ;;  %v966_v16 = vsel %vm867_vm3, 0.0, %v874_v2  ;;  %v740_v17 = vmul.f32 %v3252_v18, %v663_v8 }
  0xf0   : > { %v791_v14 = vadd.f32 %v3261_v19, %v755_v6  ;;  %v799_v15 = vadd.f32 %v3261_v19, %v763_v7  ;;  %1026 = vst.msk [vmem:[#allocation2 + $0x100] sm:$0x3] %vm420_vm2, %v989_v11  ;;  %v748_v20 = vmul.f32 %v3252_v18, %v683_v9  ;;  %v970_v21 = vsel %vm867_vm3, 0.0, %v886_v5 }
  0xf1   : > { %1037 = vst.msk [vmem:[#allocation2 + $0x158] sm:$0xff] %vm417_vm1, %v909_v12  ;;  %v776_v24 = vadd.f32 %v3261_v19, %v740_v17 }
  0xf2   : > { %v823_v22 = vmax.f32 %v791_v14, 0.0  ;;  %v831_v23 = vmax.f32 %v799_v15, 0.0  ;;  %1038 = vst.msk [vmem:[#allocation2 + $0x160] sm:$0x3] %vm420_vm2, %v993_v13  ;;  %v784_v25 = vadd.f32 %v3261_v19, %v748_v20 }
  0xf3   : > { %1003 = vst.msk [vmem:[#allocation2 + $0x48] sm:$0xff] %vm417_vm1, %v966_v16  ;;  %v808_v28 = vmax.f32 %v776_v24, 0.0 }
  0xf4   : > { %v898_v26 = vrot.slane %v823_v22, 7  ;;  %v910_v27 = vrot.slane %v831_v23, 7  ;;  %1015 = vst.msk [vmem:[#allocation2 + $0xa8] sm:$0xff] %vm417_vm1, %v970_v21  ;;  %v816_v29 = vmax.f32 %v784_v25, 0.0 }
  0xf5   : > { %v703_v30 = vpop.f32.mrf.mxu2  ;;  %v723_v31 = vpop.f32.mrf.mxu3  ;;  %v875_v38 = vrot.slane %v808_v28, 7 }
  0xf6   : > { %v974_v32 = vsel %vm867_vm3, 0.0, %v898_v26  ;;  %v978_v33 = vsel %vm867_vm3, 0.0, %v910_v27  ;;  %v756_v34 = vmul.f32 %v3252_v18, %v703_v30  ;;  %v764_v35 = vmul.f32 %v3252_v18, %v723_v31  ;;  %v666_v36 = vpop.f32.mrf.mxu0  ;;  %v686_v37 = vpop.f32.mrf.mxu1 }
  0xf7   : > { %1027 = vst.msk [vmem:[#allocation2 + $0x108] sm:$0xff] %vm417_vm1, %v974_v32  ;;  %v887_v39 = vrot.slane %v816_v29, 7  ;;  %v741_v40 = vmul.f32 %v3252_v18, %v666_v36  ;;  %v749_v41 = vmul.f32 %v3252_v18, %v686_v37  ;;  %v876_v44 = vsel %vm867_vm3, %v874_v2, %v875_v38 }
  0xf8   : > { %1039 = vst.msk [vmem:[#allocation2 + $0x168] sm:$0xff] %vm417_vm1, %v978_v33  ;;  %v792_v42 = vadd.f32 %v3261_v19, %v756_v34  ;;  %v800_v43 = vadd.f32 %v3261_v19, %v764_v35  ;;  %v982_v45 = vsel %vm867_vm3, %v875_v38, 0.0 }
  0xf9   : > { %v888_v46 = vsel %vm867_vm3, %v886_v5, %v887_v39  ;;  %v986_v47 = vsel %vm867_vm3, %v887_v39, 0.0  ;;  %1004 = vst.msk [vmem:[#allocation2 + $0x50] sm:$0xff] %vm417_vm1, %v876_v44  ;;  %v777_v50 = vadd.f32 %v3261_v19, %v741_v40  ;;  %v785_v51 = vadd.f32 %v3261_v19, %v749_v41 }
  0xfa   : > { %v824_v48 = vmax.f32 %v792_v42, 0.0  ;;  %v832_v49 = vmax.f32 %v800_v43, 0.0  ;;  %1005 = vst.msk [vmem:[#allocation2 + $0x58] sm:$0x3] %vm420_vm2, %v982_v45 }
  0xfb   : > { %1016 = vst.msk [vmem:[#allocation2 + $0xb0] sm:$0xff] %vm417_vm1, %v888_v46  ;;  %v809_v54 = vmax.f32 %v777_v50, 0.0  ;;  %v817_v55 = vmax.f32 %v785_v51, 0.0 }
  0xfc   : > { %v899_v52 = vrot.slane %v824_v48, 7  ;;  %v911_v53 = vrot.slane %v832_v49, 7  ;;  %1017 = vst.msk [vmem:[#allocation2 + $0xb8] sm:$0x3] %vm420_vm2, %v986_v47 }
  0xfd   : > { %v706_v56 = vpop.f32.mrf.mxu2  ;;  %v726_v57 = vpop.f32.mrf.mxu3  ;;  %v877_v0 = vrot.slane %v809_v54, 7  ;;  %v889_v1 = vrot.slane %v817_v55, 7 }
  0xfe   : > { %v900_v58 = vsel %vm867_vm3, %v898_v26, %v899_v52  ;;  %v990_v59 = vsel %vm867_vm3, %v899_v52, 0.0  ;;  %v912_v60 = vsel %vm867_vm3, %v910_v27, %v911_v53  ;;  %v994_v61 = vsel %vm867_vm3, %v911_v53, 0.0  ;;  %v668_v62 = vpop.f32.mrf.mxu0  ;;  %v688_v63 = vpop.f32.mrf.mxu1 }
  0xff   : > { %1028 = vst.msk [vmem:[#allocation2 + $0x110] sm:$0xff] %vm417_vm1, %v900_v58  ;;  %v757_v2 = vmul.f32 %v3252_v18, %v706_v56  ;;  %v765_v3 = vmul.f32 %v3252_v18, %v726_v57  ;;  %v742_v4 = vmul.f32 %v3252_v18, %v668_v62  ;;  %v750_v5 = vmul.f32 %v3252_v18, %v688_v63 }
 0x100   : > { %1029 = vst.msk [vmem:[#allocation2 + $0x118] sm:$0x3] %vm420_vm2, %v990_v59  ;;  %v967_v6 = vsel %vm867_vm3, 0.0, %v877_v0  ;;  %v971_v7 = vsel %vm867_vm3, 0.0, %v889_v1 }
 0x101   : > { %1040 = vst.msk [vmem:[#allocation2 + $0x170] sm:$0xff] %vm417_vm1, %v912_v60  ;;  %v793_v8 = vadd.f32 %v3261_v19, %v757_v2  ;;  %v801_v9 = vadd.f32 %v3261_v19, %v765_v3  ;;  %v778_v10 = vadd.f32 %v3261_v19, %v742_v4  ;;  %v786_v11 = vadd.f32 %v3261_v19, %v750_v5 }
 0x102   : > { %1041 = vst.msk [vmem:[#allocation2 + $0x178] sm:$0x3] %vm420_vm2, %v994_v61 }
 0x103   : > { %1006 = vst.msk [vmem:[#allocation2 + $0x60] sm:$0xff] %vm417_vm1, %v967_v6  ;;  %v825_v12 = vmax.f32 %v793_v8, 0.0  ;;  %v833_v13 = vmax.f32 %v801_v9, 0.0  ;;  %v810_v14 = vmax.f32 %v778_v10, 0.0  ;;  %v818_v15 = vmax.f32 %v786_v11, 0.0 }
 0x104   : > { %1018 = vst.msk [vmem:[#allocation2 + $0xc0] sm:$0xff] %vm417_vm1, %v971_v7 }
 0x105   : > { %v901_v16 = vrot.slane %v825_v12, 7  ;;  %v913_v17 = vrot.slane %v833_v13, 7  ;;  %v708_v20 = vpop.f32.mrf.mxu2  ;;  %v728_v21 = vpop.f32.mrf.mxu3  ;;  %v878_v22 = vrot.slane %v810_v14, 7  ;;  %v890_v23 = vrot.slane %v818_v15, 7 }
 0x106   : > { %v758_v24 = vmul.f32 %v3252_v18, %v708_v20  ;;  %v766_v25 = vmul.f32 %v3252_v18, %v728_v21 }
 0x107   : > { %v975_v26 = vsel %vm867_vm3, 0.0, %v901_v16  ;;  %v979_v27 = vsel %vm867_vm3, 0.0, %v913_v17  ;;  %v879_v28 = vsel %vm867_vm3, %v877_v0, %v878_v22  ;;  %v983_v29 = vsel %vm867_vm3, %v878_v22, 0.0 }
 0x108   : > { %1030 = vst.msk [vmem:[#allocation2 + $0x120] sm:$0xff] %vm417_vm1, %v975_v26  ;;  %v891_v30 = vsel %vm867_vm3, %v889_v1, %v890_v23  ;;  %v794_v31 = vadd.f32 %v3261_v19, %v758_v24  ;;  %v802_v32 = vadd.f32 %v3261_v19, %v766_v25  ;;  %v987_v18 = vsel %vm867_vm3, %v890_v23, 0.0 }
 0x109   : > { %1042 = vst.msk [vmem:[#allocation2 + $0x180] sm:$0xff] %vm417_vm1, %v979_v27 }
 0x10a   : > { %1007 = vst.msk [vmem:[#allocation2 + $0x68] sm:$0xff] %vm417_vm1, %v879_v28  ;;  %v826_v33 = vmax.f32 %v794_v31, 0.0  ;;  %v834_v34 = vmax.f32 %v802_v32, 0.0 }
 0x10b   : > { %1008 = vst.msk [vmem:[#allocation2 + $0x70] sm:$0x3] %vm420_vm2, %v983_v29 }
 0x10c   : > { %1019 = vst.msk [vmem:[#allocation2 + $0xc8] sm:$0xff] %vm417_vm1, %v891_v30  ;;  %v902_v35 = vrot.slane %v826_v33, 7  ;;  %v914_v36 = vrot.slane %v834_v34, 7 }
 0x10d   : > { %1020 = vst.msk [vmem:[#allocation2 + $0xd0] sm:$0x3] %vm420_vm2, %v987_v18 }
 0x10e   : > { %v903_v37 = vsel %vm867_vm3, %v901_v16, %v902_v35  ;;  %v991_v38 = vsel %vm867_vm3, %v902_v35, 0.0  ;;  %v915_v19 = vsel %vm867_vm3, %v913_v17, %v914_v36  ;;  %v995_v39 = vsel %vm867_vm3, %v914_v36, 0.0 }
 0x10f   : > { %1031 = vst.msk [vmem:[#allocation2 + $0x128] sm:$0xff] %vm417_vm1, %v903_v37 }
 0x110   : > { %1032 = vst.msk [vmem:[#allocation2 + $0x130] sm:$0x3] %vm420_vm2, %v991_v38 }
 0x111   : > { %1043 = vst.msk [vmem:[#allocation2 + $0x188] sm:$0xff] %vm417_vm1, %v915_v19 }
 0x112   : > { %1044 = vst.msk [vmem:[#allocation2 + $0x190] sm:$0x3] %vm420_vm2, %v995_v39 }
 0x113 PF: > { %v1078_v40 = vld [vmem:[#allocation6] sm:$0x3]  ;;  %vm1209_vm4 = vcmask 1041408   ;;  %v1079_v41 = vld [vmem:[#allocation6 + $0x2] sm:$0x3]  ;;  %s2444_s29 = smul.u32 192, %s2895_s19 }
 0x114   : > { %v1287_v42 = vsel %vm1209_vm4, %v1078_v40, 0  ;;  %v1211_v43 = vsel %vm1209_vm4, %v1079_v41, 0  ;;  %vm1184_vm5 = vcmask 31744   ;;  %vm1119_vm6 = vcmask 1046528   ;;  %v1080_v44 = vld [vmem:[#allocation6 + $0x4] sm:$0x3] }
 0x115   : > { %2598 = vmatpush.bf16.msra.mxu3 %v1287_v42  ;;  %2597 = vmatpush.bf16.msra.mxu2 %v1211_v43  ;;  %v1428_v45 = vsel %vm1209_vm4, %v1080_v44, 0  ;;  %v1081_v46 = vld [vmem:[#allocation6 + $0x6] sm:$0x3]  ;;  %v1082_v47 = vld [vmem:[#allocation6 + $0x8] sm:$0x3]  ;;  %s3439_s16 = scalar_lea.vmem [#allocation2], %s2444_s29 }
 0x116   : > { %1220 = vmatpush.bf16.msra.mxu0 %v1211_v43  ;;  %1296 = vmatpush.bf16.msra.mxu1 %v1287_v42  ;;  %v1500_v51 = vsel %vm1209_vm4, %v1081_v46, 0  ;;  %v1582_v52 = vsel %vm1209_vm4, %v1082_v47, 0  ;;  %v1084_v47 = vld [vmem:[#allocation6 + $0xc] sm:$0x3]  ;;  %vm1338_vm7 = vcmask 1045504   ;;  %s4149_s10 = sld [smem:[#allocation20_spill]] }
 0x117   : > { %s4150_s20 = sld [smem:[#allocation22_spill]]  ;;  %s2553_s26 = sshll.u32 %s2895_s19, 6  ;;  %vm2209_vm8 = vcmask 130048  }
 0x118   : > { %s4151_s30 = sld [smem:[#allocation23_spill]]  ;;  %s3968_s27 = scalar_lea.vmem %s3106_s11, %s2553_s26 [#allocation3] }
 0x119   : > { %v3442_v48 = vld [vmem:[%s3439_s16 + $0x60] sm:$0xff]  ;;  %v3445_v49 = vld [vmem:[%s3439_s16 + $0x68] sm:$0xff]  ;;  %v3448_v50 = vld [vmem:[%s3439_s16 + $0x70] sm:$0x3]  ;;  %1437 = vmatpush.bf16.msrb.mxu2 %v1428_v45  ;;  %1509 = vmatpush.bf16.msrb.mxu3 %v1500_v51  ;;  %s4152_s13 = sld [smem:[#allocation24_spill]]  ;;  %s2554_s28 = sshll.u32 %s2895_s19, 4 }
 0x11a   : > { %v3454_v53 = vpack.c.bf16 %v3445_v49, %v3442_v48  ;;  %v1140_v54 = vrot.slane %v3442_v48, 1  ;;  %v1141_v55 = vrot.slane %v3445_v49, 1  ;;  %v3459_v56 = vld [vmem:[%s3439_s16] sm:$0xff]  ;;  %v3462_v57 = vld [vmem:[%s3439_s16 + $0x8] sm:$0xff]  ;;  %v1143_v58 = vrot.slane %v3448_v50, 1  ;;  %1591 = vmatpush.bf16.msrb.mxu0 %v1582_v52  ;;  %v3486_v6 = vld [vmem:[%s3439_s16 + $0x78] sm:$0xff] }
 0x11b   : > { %v3466_v59 = vld [vmem:[%s3439_s16 + $0x10] sm:$0x3]  ;;  %v1120_v60 = vrot.slane %v3459_v56, 1  ;;  %v1121_v61 = vrot.slane %v3462_v57, 1  ;;  %v1087_v0 = vpack.c.bf16 %v3462_v57, %v3459_v56  ;;  %v3489_v7 = vld [vmem:[%s3439_s16 + $0x80] sm:$0xff]  ;;  %v3495_v9 = vld [vmem:[%s3439_s16 + $0x18] sm:$0xff] }
 0x11c   : > { %2457 = vmatmul.msk.bf16.vlgmr.msra.gmra.mxu3 %vm1184_vm5, %v3454_v53  ;;  %v1142_v62 = vsel %vm1119_vm6, %v1140_v54, %v1141_v55  ;;  %v1123_v63 = vrot.slane %v3466_v59, 1  ;;  %v1144_v1 = vsel %vm1119_vm6, %v1141_v55, %v1143_v58  ;;  %v3492_v8 = vld [vmem:[%s3439_s16 + $0x88] sm:$0x3]  ;;  %v3498_v10 = vld [vmem:[%s3439_s16 + $0x20] sm:$0xff]  ;;  %v1145_v12 = vrot.slane %v3486_v6, 1  ;;  %v3534_v28 = vld [vmem:[%s3439_s16 + $0x90] sm:$0xff] }
 0x11d   : > { %v1122_v2 = vsel %vm1119_vm6, %v1120_v60, %v1121_v61  ;;  %v3478_v3 = vpack.c.bf16 %v1144_v1, %v1142_v62  ;;  %2453 = vmatmul.msk.bf16.vlgmr.msra.gmra.mxu1 %vm1184_vm5, %v1087_v0  ;;  %v3501_v11 = vld [vmem:[%s3439_s16 + $0x28] sm:$0x3]  ;;  %v1146_v13 = vrot.slane %v3489_v7, 1  ;;  %v1148_v14 = vrot.slane %v3492_v8, 1  ;;  %v3537_v29 = vld [vmem:[%s3439_s16 + $0x98] sm:$0xff]  ;;  %v3543_v31 = vld [vmem:[%s3439_s16 + $0x30] sm:$0xff] }
 0x11e   : > { %v1124_v4 = vsel %vm1119_vm6, %v1121_v61, %v1123_v63  ;;  %v1125_v15 = vrot.slane %v3495_v9, 1  ;;  %v1126_v16 = vrot.slane %v3498_v10, 1  ;;  %v1128_v17 = vrot.slane %v3501_v11, 1  ;;  %v3540_v30 = vld [vmem:[%s3439_s16 + $0xa0] sm:$0x3]  ;;  %v3546_v32 = vld [vmem:[%s3439_s16 + $0x38] sm:$0xff] }
 0x11f   : > { %v1176_v5 = vpack.c.bf16 %v1124_v4, %v1122_v2  ;;  %2449 = vmatmul.msk.bf16.vlgmr.msra.gmra.mxu2 %vm1184_vm5, %v3478_v3  ;;  %v3511_v20 = vpack.c.bf16 %v3489_v7, %v3486_v6  ;;  %v1147_v21 = vsel %vm1119_vm6, %v1145_v12, %v1146_v13  ;;  %v1149_v22 = vsel %vm1119_vm6, %v1146_v13, %v1148_v14  ;;  %v3549_v18 = vld [vmem:[%s3439_s16 + $0x40] sm:$0x3]  ;;  %v3580_v46 = vld [vmem:[%s3439_s16 + $0xa8] sm:$0xff]  ;;  %v3585_v51 = vld [vmem:[%s3439_s16 + $0xb0] sm:$0xff]  ;;  %s4153_s25 = sld [smem:[#allocation25_spill]]  ;;  %s2227_s24 = scalar_lea.sflag [#allocation5], %s408_s3 }
 0x120   : > { %v1127_v23 = vsel %vm1119_vm6, %v1125_v15, %v1126_v16  ;;  %v1129_v24 = vsel %vm1119_vm6, %v1126_v16, %v1128_v17  ;;  %v3519_v25 = vpack.c.bf16 %v3498_v10, %v3495_v9  ;;  %v3523_v26 = vpack.c.bf16 %v1149_v22, %v1147_v21  ;;  %v1085_v54 = vld [vmem:[#allocation6 + $0xe] sm:$0x3]  ;;  %v1083_v55 = vld [vmem:[#allocation6 + $0xa] sm:$0x3]  ;;  %v3589_v58 = vld [vmem:[%s3439_s16 + $0xb8] sm:$0x3] }
 0x121   : > { %2445 = vmatmul.msk.bf16.vlgmr.msra.gmra.mxu0 %vm1184_vm5, %v1176_v5  ;;  %v3525_v27 = vpack.c.bf16 %v1129_v24, %v1127_v23  ;;  %v1150_v33 = vrot.slane %v3534_v28, 1  ;;  %v1151_v34 = vrot.slane %v3537_v29, 1  ;;  %v1153_v35 = vrot.slane %v3540_v30, 1  ;;  %v1086_v62 = vld [vmem:[#allocation6 + $0x10] sm:$0x3]  ;;  %v3594_v63 = vld [vmem:[%s3439_s16 + $0x48] sm:$0xff] }
 0x122   : > { %v1130_v36 = vrot.slane %v3543_v31, 1  ;;  %v1131_v37 = vrot.slane %v3546_v32, 1  ;;  %v1133_v38 = vrot.slane %v3549_v18, 1  ;;  %v3559_v19 = vpack.c.bf16 %v3537_v29, %v3534_v28  ;;  %v3597_v0 = vld [vmem:[%s3439_s16 + $0x50] sm:$0xff]  ;;  %v1059_v1 = vld [vmem:[%s3439_s16 + $0x58] sm:$0x3] }
 0x123   : > { %v1152_v39 = vsel %vm1119_vm6, %v1150_v33, %v1151_v34  ;;  %v1154_v40 = vsel %vm1119_vm6, %v1151_v34, %v1153_v35  ;;  %v3567_v43 = vpack.c.bf16 %v3546_v32, %v3543_v31  ;;  %v1733_v52 = vsel %vm1209_vm4, %v1084_v47, 0  ;;  %s4154_s11 = sld [smem:[#allocation13_spill]] }
 0x124   : > { %v1132_v41 = vsel %vm1119_vm6, %v1130_v36, %v1131_v37  ;;  %v1134_v42 = vsel %vm1119_vm6, %v1131_v37, %v1133_v38  ;;  %v3571_v44 = vpack.c.bf16 %v1154_v40, %v1152_v39  ;;  %1742 = vmatpush.bf16.msra.mxu2 %v1733_v52  ;;  %v1815_v60 = vsel %vm1209_vm4, %v1085_v54, 0  ;;  %s4155_s19 = sld [smem:[#allocation26_spill]] }
 0x125   : > { %v3573_v45 = vpack.c.bf16 %v1134_v42, %v1132_v41  ;;  %v1661_v61 = vsel %vm1209_vm4, %v1083_v55, 0  ;;  %1824 = vmatpush.bf16.msra.mxu3 %v1815_v60  ;;  %v1894_v2 = vsel %vm1209_vm4, %v1086_v62, 0  ;;  %v1155_v4 = vrot.slane %v3580_v46, 1 }
 0x126   : > { %1670 = vmatpush.bf16.msrb.mxu1 %v1661_v61  ;;  %1903 = vmatpush.bf16.msra.mxu0 %v1894_v2  ;;  %v1156_v5 = vrot.slane %v3585_v51, 1  ;;  %v1158_v12 = vrot.slane %v3589_v58, 1  ;;  %v1135_v13 = vrot.slane %v3594_v63, 1  ;;  %v1136_v14 = vrot.slane %v3597_v0, 1 }
 0x127   : > { %v1138_v15 = vrot.slane %v1059_v1, 1  ;;  %v3608_v16 = vpack.c.bf16 %v3585_v51, %v3580_v46  ;;  %v3616_v24 = vpack.c.bf16 %v3597_v0, %v3594_v63  ;;  %v1347_v35 = vrot.slane %v3501_v11, 2 }
 0x128   : > { %v1157_v17 = vsel %vm1119_vm6, %v1155_v4, %v1156_v5  ;;  %v1159_v21 = vsel %vm1119_vm6, %v1156_v5, %v1158_v12  ;;  %v1137_v22 = vsel %vm1119_vm6, %v1135_v13, %v1136_v14  ;;  %v1344_v36 = vrot.slane %v3495_v9, 2 }
 0x129   : > { %v1139_v23 = vsel %vm1119_vm6, %v1136_v14, %v1138_v15  ;;  %v3620_v33 = vpack.c.bf16 %v1159_v21, %v1157_v17  ;;  %v1345_v37 = vrot.slane %v3498_v10, 2  ;;  %v1342_v38 = vrot.slane %v3466_v59, 2 }
 0x12a   : > { %v3622_v34 = vpack.c.bf16 %v1139_v23, %v1137_v22  ;;  %v1339_v39 = vrot.slane %v3459_v56, 2  ;;  %v1340_v40 = vrot.slane %v3462_v57, 2  ;;  %v1349_v56 = vrot.slane %v3543_v31, 2  ;;  %s4156_s7 = smov %s4155_s19 }
 0x12b   : > { %v1346_v41 = vsel %vm1338_vm7, %v1344_v36, %v1345_v37  ;;  %v1348_v42 = vsel %vm1338_vm7, %v1345_v37, %v1347_v35  ;;  %v1350_v57 = vrot.slane %v3546_v32, 2  ;;  %v1352_v59 = vrot.slane %v3549_v18, 2 }
 0x12c   : > { %2458 = vmatmul.msk.bf16.gmra.mxu3 %vm1184_vm5, %v3511_v20  ;;  %v1341_v47 = vsel %vm1338_vm7, %v1339_v39, %v1340_v40  ;;  %v1343_v52 = vsel %vm1338_vm7, %v1340_v40, %v1342_v38  ;;  %v1396_v11 = vpack.c.bf16 %v1348_v42, %v1346_v41  ;;  %v1360_v60 = vrot.slane %v3445_v49, 2 }
 0x12d   : > { %2454 = vmatmul.msk.bf16.gmra.mxu1 %vm1184_vm5, %v3519_v25  ;;  %v1395_v9 = vpack.c.bf16 %v1343_v52, %v1341_v47  ;;  %v1351_v10 = vsel %vm1338_vm7, %v1349_v56, %v1350_v57  ;;  %v1353_v54 = vsel %vm1338_vm7, %v1350_v57, %v1352_v59  ;;  %v1362_v31 = vrot.slane %v3448_v50, 2 }
 0x12e   : > { %v3651_v55 = vpack.c.bf16 %v1353_v54, %v1351_v10  ;;  %v1354_v32 = vrot.slane %v3594_v63, 2  ;;  %v1355_v18 = vrot.slane %v3597_v0, 2  ;;  %v1357_v61 = vrot.slane %v1059_v1, 2 }
 0x12f   : > { %2450 = vmatmul.msk.bf16.gmra.mxu2 %vm1184_vm5, %v3523_v26  ;;  %v1364_v50 = vrot.slane %v3486_v6, 2  ;;  %v1365_v63 = vrot.slane %v3489_v7, 2  ;;  %v1367_v0 = vrot.slane %v3492_v8, 2  ;;  %v1369_v6 = vrot.slane %v3534_v28, 2 }
 0x130   : > { %v1356_v62 = vsel %vm1338_vm7, %v1354_v32, %v1355_v18  ;;  %v1358_v2 = vsel %vm1338_vm7, %v1355_v18, %v1357_v61  ;;  %v1370_v7 = vrot.slane %v3537_v29, 2  ;;  %v1372_v8 = vrot.slane %v3540_v30, 2  ;;  %v1072_v18 = vld [vmem:[%s3439_s16 + $0xc0] sm:$0xff]  ;;  %v1073_v61 = vld [vmem:[%s3439_s16 + $0xc8] sm:$0xff] }
 0x131   : > { %2446 = vmatmul.msk.bf16.gmra.mxu0 %vm1184_vm5, %v3525_v27  ;;  %v3671_v4 = vpack.c.bf16 %v1358_v2, %v1356_v62  ;;  %v1366_v1 = vsel %vm1338_vm7, %v1364_v50, %v1365_v63  ;;  %v1368_v5 = vsel %vm1338_vm7, %v1365_v63, %v1367_v0  ;;  %v1374_v35 = vrot.slane %v3580_v46, 2 }
 0x132   : > { %v3686_v12 = vpack.c.bf16 %v1368_v5, %v1366_v1  ;;  %v1371_v13 = vsel %vm1338_vm7, %v1369_v6, %v1370_v7  ;;  %v1373_v14 = vsel %vm1338_vm7, %v1370_v7, %v1372_v8  ;;  %v1375_v36 = vrot.slane %v3585_v51, 2 }
 0x133   : > { %v3701_v15 = vpack.c.bf16 %v1373_v14, %v1371_v13  ;;  %v1377_v39 = vrot.slane %v3589_v58, 2  ;;  %v1649_v2 = vrot.slane %v1072_v18, 2  ;;  %v1650_v50 = vrot.slane %v1073_v61, 2 }
 0x134   : > { %v1376_v40 = vsel %vm1338_vm7, %v1374_v35, %v1375_v36  ;;  %v1570_v6 = vrot.slane %v1072_v18, 1  ;;  %v1571_v7 = vrot.slane %v1073_v61, 1 }
 0x135   : > { %v1378_v41 = vsel %vm1338_vm7, %v1375_v36, %v1377_v39  ;;  %v1651_v14 = vsel %vm1338_vm7, %v1649_v2, %v1650_v50 }
 0x136   : > { %v3724_v42 = vpack.c.bf16 %v1378_v41, %v1376_v40 }
 0x13c   : > { %2459 = vmatmul.msk.bf16.gmra.mxu3 %vm1184_vm5, %v3559_v19 }
 0x13d   : > { %2455 = vmatmul.msk.bf16.gmra.mxu1 %vm1184_vm5, %v3567_v43 }
 0x13f   : > { %2451 = vmatmul.msk.bf16.gmra.mxu2 %vm1184_vm5, %v3571_v44 }
 0x141   : > { %2447 = vmatmul.msk.bf16.gmra.mxu0 %vm1184_vm5, %v3573_v45 }
 0x14c   : > { %2460 = vmatmul.msk.bf16.gmra.mxu3 %vm1184_vm5, %v3608_v16 }
 0x14d   : > { %2456 = vmatmul.msk.bf16.gmra.mxu1 %vm1184_vm5, %v3616_v24 }
 0x14f   : > { %2452 = vmatmul.msk.bf16.gmra.mxu2 %vm1184_vm5, %v3620_v33 }
 0x151   : > { %2448 = vmatmul.msk.bf16.gmra.mxu0 %vm1184_vm5, %v3622_v34 }
 0x15c   : > { %2469 = vmatmul.msk.bf16.vlgmr.msrb.gmra.mxu3 %vm1184_vm5, %v3519_v25  ;;  %v1359_v25 = vrot.slane %v3442_v48, 2  ;;  %v1363_v48 = vsel %vm1338_vm7, %v1360_v60, %v1362_v31 }
 0x15d   : > { %2485 = vmatmul.msk.bf16.vlgmr.msrb.gmra.mxu1 %vm1184_vm5, %v1396_v11 }
 0x15f   : > { %2461 = vmatmul.msk.bf16.vlgmr.msrb.gmra.mxu2 %vm1184_vm5, %v1395_v9 }
 0x161   : > { %2477 = vmatmul.msk.bf16.vlgmr.msrb.gmra.mxu0 %vm1184_vm5, %v3525_v27  ;;  %v1361_v27 = vsel %vm1338_vm7, %v1359_v25, %v1360_v60 }
 0x162   : > { %v3667_v49 = vpack.c.bf16 %v1363_v48, %v1361_v27  ;;  %v1074_v48 = vld [vmem:[%s3439_s16 + $0xd0] sm:$0x3] }
 0x163   : > { %v1652_v63 = vrot.slane %v1074_v48, 2  ;;  %v1573_v8 = vrot.slane %v1074_v48, 1 }
 0x16c   : > { %2470 = vmatmul.msk.bf16.gmra.mxu3 %vm1184_vm5, %v3567_v43 }
 0x16d   : > { %2486 = vmatmul.msk.bf16.gmra.mxu1 %vm1184_vm5, %v3651_v55 }
 0x16f   : > { %2462 = vmatmul.msk.bf16.gmra.mxu2 %vm1184_vm5, %v1396_v11 }
 0x171   : > { %2478 = vmatmul.msk.bf16.gmra.mxu0 %vm1184_vm5, %v3573_v45 }
 0x17c   : > { %2471 = vmatmul.msk.bf16.gmra.mxu3 %vm1184_vm5, %v3616_v24 }
 0x17d   : > { %2487 = vmatmul.msk.bf16.gmra.mxu1 %vm1184_vm5, %v3671_v4 }
 0x17f   : > { %2463 = vmatmul.msk.bf16.gmra.mxu2 %vm1184_vm5, %v3651_v55 }
 0x181   : > { %2479 = vmatmul.msk.bf16.gmra.mxu0 %vm1184_vm5, %v3622_v34 }
 0x18c   : > { %2472 = vmatmul.msk.bf16.gmra.mxu3 %vm1184_vm5, %v3454_v53 }
 0x18d   : > { %2488 = vmatmul.msk.bf16.gmra.mxu1 %vm1184_vm5, %v3667_v49 }
 0x18f   : > { %2464 = vmatmul.msk.bf16.gmra.mxu2 %vm1184_vm5, %v3671_v4 }
 0x191   : > { %2480 = vmatmul.msk.bf16.gmra.mxu0 %vm1184_vm5, %v3478_v3 }
 0x19a   : > { %v1298_v17 = vpop.f32.mrf.mxu1 }
 0x19c   : > { %2473 = vmatmul.msk.bf16.gmra.mxu3 %vm1184_vm5, %v3511_v20 }
 0x19d   : > { %2489 = vmatmul.msk.bf16.gmra.mxu1 %vm1184_vm5, %v3686_v12 }
 0x19e   : > { %v1222_v21 = vpop.f32.mrf.mxu0 }
 0x19f   : > { %v3707_v22 = vadd.f32 %v1298_v17, %v1222_v21  ;;  %v1318_v28 = vpop.f32.mrf.mxu3  ;;  %2465 = vmatmul.msk.bf16.gmra.mxu2 %vm1184_vm5, %v3667_v49  ;;  %v1653_v17 = vsel %vm1338_vm7, %v1650_v50, %v1652_v63  ;;  %v3767_v21 = vpack.c.bf16 %v1073_v61, %v1072_v18 }
 0x1a0   : > { %v3771_v35 = vpack.c.bf16 %v1653_v17, %v1651_v14 }
 0x1a1   : > { %2481 = vmatmul.msk.bf16.gmra.mxu0 %vm1184_vm5, %v3523_v26 }
 0x1a2   : > { %v1242_v29 = vpop.f32.mrf.mxu2  ;;  %v3713_v30 = vpop.f32.mrf.mxu1 }
 0x1a3   : > { %v3715_v23 = vadd.f32 %v1318_v28, %v1242_v29  ;;  %v1572_v28 = vsel %vm1119_vm6, %v1570_v6, %v1571_v7  ;;  %v1574_v29 = vsel %vm1119_vm6, %v1571_v7, %v1573_v8 }
 0x1a4   : > { %v3777_v39 = vpack.c.bf16 %v1574_v29, %v1572_v28 }
 0x1a6   : > { %v3719_v37 = vpop.f32.mrf.mxu0 }
 0x1a7   : > { %v1320_v38 = vpop.f32.mrf.mxu3 }
 0x1aa   : > { %v1244_v47 = vpop.f32.mrf.mxu2  ;;  %v1303_v52 = vpop.f32.mrf.mxu1 }
 0x1ab   : > { %v3726_v11 = vadd.f32 %v1320_v38, %v1244_v47 }
 0x1ac   : > { %2474 = vmatmul.msk.bf16.gmra.mxu3 %vm1184_vm5, %v3559_v19 }
 0x1ad   : > { %2490 = vmatmul.msk.bf16.gmra.mxu1 %vm1184_vm5, %v3701_v15 }
 0x1ae   : > { %v1227_v46 = vpop.f32.mrf.mxu0 }
 0x1af   : > { %v3732_v51 = vadd.f32 %v1303_v52, %v1227_v46  ;;  %v1323_v58 = vpop.f32.mrf.mxu3  ;;  %2466 = vmatmul.msk.bf16.gmra.mxu2 %vm1184_vm5, %v3686_v12 }
 0x1b1   : > { %2482 = vmatmul.msk.bf16.gmra.mxu0 %vm1184_vm5, %v3571_v44 }
 0x1b2   : > { %v1247_v9 = vpop.f32.mrf.mxu2  ;;  %v3738_v56 = vpop.f32.mrf.mxu1 }
 0x1b3   : > { %v3740_v57 = vadd.f32 %v1323_v58, %v1247_v9 }
 0x1b6   : > { %v3742_v59 = vpop.f32.mrf.mxu0 }
 0x1b7   : > { %v1325_v10 = vpop.f32.mrf.mxu3 }
 0x1ba   : > { %v1249_v54 = vpop.f32.mrf.mxu2  ;;  %v1308_v25 = vpop.f32.mrf.mxu1 }
 0x1bb   : > { %v3744_v60 = vadd.f32 %v1325_v10, %v1249_v54  ;;  %v2025_v54 = vld [vmem:[%s4149_s10] sm:$0x3]  ;;  %s2530_s10 = sshll.u32 %s4154_s11, 5  ;;  %s2805_s11 = scalar_lea.hbm %s4156_s7, 512 }
 0x1bc   : > { %2475 = vmatmul.msk.bf16.gmra.mxu3 %vm1184_vm5, %v3608_v16  ;;  %s2239_s2 = sadd.s32 %s2554_s28, %s2530_s10 }
 0x1bd   : > { %2491 = vmatmul.msk.bf16.gmra.mxu1 %vm1184_vm5, %v3724_v42  ;;  %s2531_s21 = sshll.u32 %s2239_s2, 3 }
 0x1be   : > { %v1232_v27 = vpop.f32.mrf.mxu0 }
 0x1bf   : > { %v3750_v31 = vadd.f32 %v1308_v25, %v1232_v27  ;;  %v1328_v32 = vpop.f32.mrf.mxu3  ;;  %2467 = vmatmul.msk.bf16.gmra.mxu2 %vm1184_vm5, %v3701_v15  ;;  %v2051_v27 = vsel %vm1209_vm4, %v2025_v54, 0 }
 0x1c0   : > { %2060 = vmatpush.bf16.msra.mxu1 %v2051_v27 }
 0x1c1   : > { %2483 = vmatmul.msk.bf16.gmra.mxu0 %vm1184_vm5, %v3620_v33 }
 0x1c2   : > { %v1252_v62 = vpop.f32.mrf.mxu2  ;;  %v3761_v1 = vpop.f32.mrf.mxu1 }
 0x1c3   : > { %v3759_v0 = vadd.f32 %v1328_v32, %v1252_v62 }
 0x1c6   : > { %v3763_v5 = vpop.f32.mrf.mxu0 }
 0x1c7   : > { %v1330_v13 = vpop.f32.mrf.mxu3 }
 0x1ca   : > { %v1254_v36 = vpop.f32.mrf.mxu2  ;;  %v1313_v41 = vpop.f32.mrf.mxu1 }
 0x1cb   : > { %v3773_v38 = vadd.f32 %v1330_v13, %v1254_v36 }
 0x1cc   : > { %2476 = vmatmul.msk.bf16.gmra.mxu3 %vm1184_vm5, %v3767_v21 }
 0x1cd   : > { %2492 = vmatmul.msk.bf16.gmra.mxu1 %vm1184_vm5, %v3771_v35 }
 0x1ce   : > { %v1237_v40 = vpop.f32.mrf.mxu0 }
 0x1cf   : > { %v3781_v47 = vadd.f32 %v1313_v41, %v1237_v40  ;;  %v1333_v52 = vpop.f32.mrf.mxu3  ;;  %2468 = vmatmul.msk.bf16.gmra.mxu2 %vm1184_vm5, %v3724_v42 }
 0x1d1   : > { %2484 = vmatmul.msk.bf16.gmra.mxu0 %vm1184_vm5, %v3777_v39 }
 0x1d2   : > { %v1257_v46 = vpop.f32.mrf.mxu2 }
 0x1d3   : > { %v3787_v58 = vadd.f32 %v1333_v52, %v1257_v46 }
 0x1d6   : > { %v3789_v9 = vpop.f32.mrf.mxu0 }
 0x1d7   : > { %v1335_v10 = vpop.f32.mrf.mxu3 }
 0x1da   : > { %v1259_v25 = vpop.f32.mrf.mxu2 }
 0x1db   : > { %v3795_v32 = vadd.f32 %v1335_v10, %v1259_v25 }
 0x1dc   : > { %2501 = vmatmul.msk.bf16.vlgmr.msra.gmra.mxu3 %vm1184_vm5, %v3573_v45  ;;  %v1301_v45 = vadd.f32 %v3713_v30, %v3719_v37 }
 0x1de   : > { %v1593_v18 = vpop.f32.mrf.mxu0 }
 0x1df   : > { %v1511_v61 = vpop.f32.mrf.mxu3  ;;  %2493 = vmatmul.msk.bf16.vlgmr.msra.gmra.mxu2 %vm1184_vm5, %v3567_v43 }
 0x1e1   : > { %2509 = vmatmul.msk.bf16.vlgmr.msra.gmra.mxu0 %vm1184_vm5, %v3651_v55 }
 0x1e2   : > { %v1439_v48 = vpop.f32.mrf.mxu2 }
 0x1e3   : > { %v1479_v62 = vadd.f32 %v1439_v48, %v3707_v22 }
 0x1e5   : > { %v1551_v2 = vadd.f32 %v1511_v61, %v1479_v62  ;;  %v1315_v62 = vpop.f32.mrf.mxu1 }
 0x1e6   : > { %v1595_v50 = vpop.f32.mrf.mxu0 }
 0x1e7   : > { %v1513_v63 = vpop.f32.mrf.mxu3  ;;  %v3804_v6 = vadd.f32 %v1593_v18, %v1551_v2 }
 0x1ea   : > { %v1441_v7 = vpop.f32.mrf.mxu2 }
 0x1eb   : > { %v1480_v8 = vadd.f32 %v1441_v7, %v1301_v45 }
 0x1ec   : > { %2502 = vmatmul.msk.bf16.gmra.mxu3 %vm1184_vm5, %v3622_v34  ;;  %v1306_v34 = vadd.f32 %v3738_v56, %v3742_v59 }
 0x1ed   : > { %v1552_v43 = vadd.f32 %v1513_v63, %v1480_v8 }
 0x1ee   : > { %v1598_v13 = vpop.f32.mrf.mxu0 }
 0x1ef   : > { %v1516_v14 = vpop.f32.mrf.mxu3  ;;  %2494 = vmatmul.msk.bf16.gmra.mxu2 %vm1184_vm5, %v3616_v24  ;;  %v3812_v55 = vadd.f32 %v1595_v50, %v1552_v43 }
 0x1f1   : > { %2510 = vmatmul.msk.bf16.gmra.mxu0 %vm1184_vm5, %v3671_v4 }
 0x1f2   : > { %v1444_v22 = vpop.f32.mrf.mxu2 }
 0x1f3   : > { %v1481_v17 = vadd.f32 %v1444_v22, %v3732_v51 }
 0x1f5   : > { %v1553_v30 = vadd.f32 %v1516_v14, %v1481_v17 }
 0x1f6   : > { %v1600_v37 = vpop.f32.mrf.mxu0 }
 0x1f7   : > { %v1518_v28 = vpop.f32.mrf.mxu3  ;;  %v3817_v29 = vadd.f32 %v1598_v13, %v1553_v30 }
 0x1fa   : > { %v1446_v36 = vpop.f32.mrf.mxu2 }
 0x1fb   : > { %v1482_v40 = vadd.f32 %v1446_v36, %v1306_v34 }
 0x1fc   : > { %2503 = vmatmul.msk.bf16.gmra.mxu3 %vm1184_vm5, %v3478_v3  ;;  %v1311_v3 = vadd.f32 %v3761_v1, %v3763_v5 }
 0x1fd   : > { %v1554_v24 = vadd.f32 %v1518_v28, %v1482_v40 }
 0x1fe   : > { %v1603_v41 = vpop.f32.mrf.mxu0 }
 0x1ff   : > { %v1521_v52 = vpop.f32.mrf.mxu3  ;;  %2495 = vmatmul.msk.bf16.gmra.mxu2 %vm1184_vm5, %v3454_v53  ;;  %v3825_v4 = vadd.f32 %v1600_v37, %v1554_v24 }
 0x201   : > { %2511 = vmatmul.msk.bf16.gmra.mxu0 %vm1184_vm5, %v3667_v49 }
 0x202   : > { %v1449_v51 = vpop.f32.mrf.mxu2 }
 0x203   : > { %v1483_v46 = vadd.f32 %v1449_v51, %v3750_v31  ;;  %v1076_v51 = vld [vmem:[%s3439_s16 + $0xe0] sm:$0xff] }
 0x205   : > { %v1555_v56 = vadd.f32 %v1521_v52, %v1483_v46  ;;  %v1075_v52 = vld [vmem:[%s3439_s16 + $0xd8] sm:$0xff]  ;;  %v1077_v46 = vld [vmem:[%s3439_s16 + $0xe8] sm:$0x3] }
 0x206   : > { %v1605_v59 = vpop.f32.mrf.mxu0 }
 0x207   : > { %v1523_v10 = vpop.f32.mrf.mxu3  ;;  %v3830_v54 = vadd.f32 %v1603_v41, %v1555_v56  ;;  %v1672_v56 = vpop.f32.mrf.mxu1 }
 0x20a   : > { %v1451_v25 = vpop.f32.mrf.mxu2 }
 0x20b   : > { %v1484_v27 = vadd.f32 %v1451_v25, %v1311_v3 }
 0x20c   : > { %2504 = vmatmul.msk.bf16.gmra.mxu3 %vm1184_vm5, %v3523_v26  ;;  %v1316_v26 = vadd.f32 %v1315_v62, %v3789_v9 }
 0x20d   : > { %v1556_v53 = vadd.f32 %v1523_v10, %v1484_v27  ;;  %v1806_v10 = vrot.slane %v1077_v46, 1 }
 0x20e   : > { %v1608_v18 = vpop.f32.mrf.mxu0 }
 0x20f   : > { %v1526_v61 = vpop.f32.mrf.mxu3  ;;  %2496 = vmatmul.msk.bf16.gmra.mxu2 %vm1184_vm5, %v3511_v20  ;;  %v3838_v49 = vadd.f32 %v1605_v59, %v1556_v53  ;;  %v1803_v59 = vrot.slane %v1075_v52, 1 }
 0x211   : > { %2512 = vmatmul.msk.bf16.gmra.mxu0 %vm1184_vm5, %v3686_v12 }
 0x212   : > { %v1454_v31 = vpop.f32.mrf.mxu2 }
 0x213   : > { %v1485_v48 = vadd.f32 %v1454_v31, %v3781_v47  ;;  %v1885_v31 = vrot.slane %v1077_v46, 2 }
 0x215   : > { %v1557_v1 = vadd.f32 %v1526_v61, %v1485_v48  ;;  %v1882_v61 = vrot.slane %v1075_v52, 2 }
 0x216   : > { %v1610_v5 = vpop.f32.mrf.mxu0 }
 0x217   : > { %v1528_v2 = vpop.f32.mrf.mxu3  ;;  %v3843_v50 = vadd.f32 %v1608_v18, %v1557_v1 }
 0x21a   : > { %v1456_v63 = vpop.f32.mrf.mxu2 }
 0x21b   : > { %v1486_v45 = vadd.f32 %v1456_v63, %v1316_v26  ;;  %v1728_v63 = vpack.c.bf16 %v1076_v51, %v1075_v52 }
 0x21c   : > { %2505 = vmatmul.msk.bf16.gmra.mxu3 %vm1184_vm5, %v3571_v44 }
 0x21d   : > { %v1558_v20 = vadd.f32 %v1528_v2, %v1486_v45  ;;  %v1674_v2 = vpop.f32.mrf.mxu1 }
 0x21e   : > { %v1613_v7 = vpop.f32.mrf.mxu0 }
 0x21f   : > { %v1531_v8 = vpop.f32.mrf.mxu3  ;;  %2497 = vmatmul.msk.bf16.gmra.mxu2 %vm1184_vm5, %v3559_v19  ;;  %v3850_v12 = vadd.f32 %v1610_v5, %v1558_v20 }
 0x221   : > { %2513 = vmatmul.msk.bf16.gmra.mxu0 %vm1184_vm5, %v3701_v15 }
 0x222   : > { %v1459_v47 = vpop.f32.mrf.mxu2 }
 0x223   : > { %v1487_v43 = vadd.f32 %v1459_v47, %v3715_v23 }
 0x225   : > { %v1559_v9 = vadd.f32 %v1531_v8, %v1487_v43 }
 0x226   : > { %v1615_v13 = vpop.f32.mrf.mxu0 }
 0x227   : > { %v1533_v14 = vpop.f32.mrf.mxu3  ;;  %v3855_v22 = vadd.f32 %v1613_v7, %v1559_v9 }
 0x22a   : > { %v1461_v44 = vpop.f32.mrf.mxu2 }
 0x22b   : > { %v1488_v17 = vadd.f32 %v1461_v44, %v3726_v11 }
 0x22c   : > { %2506 = vmatmul.msk.bf16.gmra.mxu3 %vm1184_vm5, %v3620_v33 }
 0x22d   : > { %v1560_v19 = vadd.f32 %v1533_v14, %v1488_v17 }
 0x22e   : > { %v1618_v30 = vpop.f32.mrf.mxu0 }
 0x22f   : > { %v1536_v37 = vpop.f32.mrf.mxu3  ;;  %2498 = vmatmul.msk.bf16.gmra.mxu2 %vm1184_vm5, %v3608_v16  ;;  %v3862_v15 = vadd.f32 %v1615_v13, %v1560_v19  ;;  %v1677_v13 = vpop.f32.mrf.mxu1 }
 0x231   : > { %2514 = vmatmul.msk.bf16.gmra.mxu0 %vm1184_vm5, %v3724_v42 }
 0x232   : > { %v1464_v23 = vpop.f32.mrf.mxu2 }
 0x233   : > { %v1489_v11 = vadd.f32 %v1464_v23, %v3740_v57 }
 0x235   : > { %v1561_v28 = vadd.f32 %v1536_v37, %v1489_v11 }
 0x236   : > { %v1620_v34 = vpop.f32.mrf.mxu0 }
 0x237   : > { %v1538_v33 = vpop.f32.mrf.mxu3  ;;  %v3867_v36 = vadd.f32 %v1618_v30, %v1561_v28  ;;  %v1679_v11 = vpop.f32.mrf.mxu1 }
 0x23a   : > { %v1466_v40 = vpop.f32.mrf.mxu2 }
 0x23b   : > { %v1490_v24 = vadd.f32 %v1466_v40, %v3744_v60  ;;  %v1804_v60 = vrot.slane %v1076_v51, 1 }
 0x23c   : > { %2507 = vmatmul.msk.bf16.gmra.mxu3 %vm1184_vm5, %v3777_v39 }
 0x23d   : > { %v1562_v16 = vadd.f32 %v1538_v33, %v1490_v24  ;;  %v1805_v25 = vsel %vm1119_vm6, %v1803_v59, %v1804_v60  ;;  %v1807_v27 = vsel %vm1119_vm6, %v1804_v60, %v1806_v10  ;;  %v1712_v33 = vadd.f32 %v1672_v56, %v3804_v6  ;;  %v3911_v6 = vld [vmem:[%s4151_s30] ss:$0 sm:$0xff]  ;;  %s2241_s30 = scalar_lea.hbm %s4155_s19, %s2531_s21 }
 0x23e   : > { %v1623_v41 = vpop.f32.mrf.mxu0  ;;  %v1810_v5 = vpack.c.bf16 %v1807_v27, %v1805_v25  ;;  %s2244_s12 = sshll.u32 %s2241_s30, 4  ;;  %s2245_s12 = int_to_ptr.hbm [resolvable:$true] %s2244_s12 }
 0x23f   : > { %v1541_v42 = vpop.f32.mrf.mxu3  ;;  %2499 = vmatmul.msk.bf16.gmra.mxu2 %vm1184_vm5, %v3767_v21  ;;  %v3877_v57 = vadd.f32 %v1620_v34, %v1562_v16  ;;  %v1883_v21 = vrot.slane %v1076_v51, 2  ;;  %v1682_v52 = vpop.f32.mrf.mxu1  ;;  %v1713_v51 = vadd.f32 %v1674_v2, %v3812_v55  ;;  %v1714_v55 = vadd.f32 %v1677_v13, %v3817_v29 }
 0x240   : > { %v1716_v13 = vadd.f32 %v1682_v52, %v3830_v54 }
 0x241   : > { %2515 = vmatmul.msk.bf16.gmra.mxu0 %vm1184_vm5, %v3771_v35  ;;  %v1884_v35 = vsel %vm1338_vm7, %v1882_v61, %v1883_v21  ;;  %v1886_v62 = vsel %vm1338_vm7, %v1883_v21, %v1885_v31 }
 0x242   : > { %v1469_v3 = vpop.f32.mrf.mxu2  ;;  %v1889_v45 = vpack.c.bf16 %v1886_v62, %v1884_v35 }
 0x243   : > { %v1491_v39 = vadd.f32 %v1469_v3, %v3759_v0 }
 0x245   : > { %v1563_v53 = vadd.f32 %v1541_v42, %v1491_v39 }
 0x246   : > { %v1625_v18 = vpop.f32.mrf.mxu0 }
 0x247   : > { %v1543_v48 = vpop.f32.mrf.mxu3  ;;  %v3884_v1 = vadd.f32 %v1623_v41, %v1563_v53  ;;  %v1684_v53 = vpop.f32.mrf.mxu1 }
 0x24a   : > { %v1471_v26 = vpop.f32.mrf.mxu2 }
 0x24b   : > { %v1492_v0 = vadd.f32 %v1471_v26, %v3773_v38  ;;  %v1715_v26 = vadd.f32 %v1679_v11, %v3825_v4 }
 0x24c   : > { %2508 = vmatmul.msk.bf16.gmra.mxu3 %vm1184_vm5, %v1810_v5 }
 0x24d   : > { %v1564_v20 = vadd.f32 %v1543_v48, %v1492_v0 }
 0x24e   : > { %v1628_v7 = vpop.f32.mrf.mxu0 }
 0x24f   : > { %v1546_v8 = vpop.f32.mrf.mxu3  ;;  %2500 = vmatmul.msk.bf16.gmra.mxu2 %vm1184_vm5, %v1728_v63  ;;  %v3891_v47 = vadd.f32 %v1625_v18, %v1564_v20 }
 0x251   : > { %2516 = vmatmul.msk.bf16.gmra.mxu0 %vm1184_vm5, %v1889_v45  ;;  %v1687_v45 = vpop.f32.mrf.mxu1 }
 0x252   : > { %v1474_v43 = vpop.f32.mrf.mxu2 }
 0x253   : > { %v1493_v9 = vadd.f32 %v1474_v43, %v3787_v58 }
 0x255   : > { %v1565_v14 = vadd.f32 %v1546_v8, %v1493_v9 }
 0x256   : > { %v1630_v44 = vpop.f32.mrf.mxu0 }
 0x257   : > { %v1548_v38 = vpop.f32.mrf.mxu3  ;;  %v3895_v17 = vadd.f32 %v1628_v7, %v1565_v14 }
 0x25a   : > { %v1476_v19 = vpop.f32.mrf.mxu2 }
 0x25b   : > { %v1494_v30 = vadd.f32 %v1476_v19, %v3795_v32  ;;  %v3905_v32 = vld [vmem:[%s4150_s20] ss:$0 sm:$0xff] }
 0x25d   : > { %v1566_v37 = vadd.f32 %v1548_v38, %v1494_v30 }
 0x25e   : > { %v1905_v23 = vpop.f32.mrf.mxu0 }
 0x25f   : > { %v1826_v28 = vpop.f32.mrf.mxu3  ;;  %v3898_v34 = vadd.f32 %v1630_v44, %v1566_v37 }
 0x262   : > { %v1744_v40 = vpop.f32.mrf.mxu2 }
 0x263   : > { %v1784_v24 = vadd.f32 %v1744_v40, %v1712_v33 }
 0x265   : > { %v1866_v58 = vadd.f32 %v1826_v28, %v1784_v24  ;;  %v1689_v28 = vpop.f32.mrf.mxu1  ;;  %v1717_v24 = vadd.f32 %v1684_v53, %v3838_v49 }
 0x266   : > { %v1907_v16 = vpop.f32.mrf.mxu0 }
 0x267   : > { %v1828_v41 = vpop.f32.mrf.mxu3  ;;  %v1945_v46 = vadd.f32 %v1905_v23, %v1866_v58 }
 0x269   : > { %v1965_v60 = vmul.f32 %v3905_v32, %v1945_v46 }
 0x26a   : > { %v1746_v42 = vpop.f32.mrf.mxu2 }
 0x26b   : > { %v1785_v59 = vadd.f32 %v1746_v42, %v1713_v51  ;;  %v1985_v25 = vadd.f32 %v3911_v6, %v1965_v60  ;;  %v1718_v60 = vadd.f32 %v1687_v45, %v3843_v50 }
 0x26d   : > { %v1867_v56 = vadd.f32 %v1828_v41, %v1785_v59  ;;  %v2001_v31 = vmax.f32 %v1985_v25, 0.0  ;;  %v1692_v59 = vpop.f32.mrf.mxu1 }
 0x26e   : > { %v1910_v10 = vpop.f32.mrf.mxu0 }
 0x26f   : > { %v1831_v3 = vpop.f32.mrf.mxu3  ;;  %v1946_v39 = vadd.f32 %v1907_v16, %v1867_v56 }
 0x271   : > { %v1966_v27 = vmul.f32 %v3905_v32, %v1946_v39 }
 0x272   : > { %v1749_v18 = vpop.f32.mrf.mxu2 }
 0x273   : > { %v1986_v61 = vadd.f32 %v3911_v6, %v1966_v27  ;;  %v1786_v21 = vadd.f32 %v1749_v18, %v1714_v55 }
 0x275   : > { %v2002_v48 = vmax.f32 %v1986_v61, 0.0  ;;  %v1868_v5 = vadd.f32 %v1831_v3, %v1786_v21  ;;  %v1719_v21 = vadd.f32 %v1689_v28, %v3850_v12  ;;  %v1694_v50 = vpop.f32.mrf.mxu1 }
 0x276   : > { %v1912_v35 = vpop.f32.mrf.mxu0 }
 0x277   : > { %v1833_v62 = vpop.f32.mrf.mxu3  ;;  %v2017_v2 = vpack.c.bf16 %v2002_v48, %v2001_v31  ;;  %v1947_v0 = vadd.f32 %v1910_v10, %v1868_v5 }
 0x279   : > { %2517 = vmatmul.msk.bf16.vlgmr.msra.gmra.mxu1 %vm1184_vm5, %v2017_v2  ;;  %v1967_v20 = vmul.f32 %v3905_v32, %v1947_v0 }
 0x27a   : > { %v1751_v29 = vpop.f32.mrf.mxu2 }
 0x27b   : > { %v1787_v63 = vadd.f32 %v1751_v29, %v1715_v26  ;;  %v1987_v14 = vadd.f32 %v3911_v6, %v1967_v20  ;;  %v1720_v29 = vadd.f32 %v1692_v59, %v3855_v22 }
 0x27d   : > { %v1869_v7 = vadd.f32 %v1833_v62, %v1787_v63  ;;  %v2003_v30 = vmax.f32 %v1987_v14, 0.0 }
 0x27e   : > { %v1915_v8 = vpop.f32.mrf.mxu0 }
 0x27f   : > { %v1836_v43 = vpop.f32.mrf.mxu3  ;;  %v1948_v9 = vadd.f32 %v1912_v35, %v1869_v7 }
 0x281   : > { %v1968_v44 = vmul.f32 %v3905_v32, %v1948_v9 }
 0x282   : > { %v1754_v38 = vpop.f32.mrf.mxu2 }
 0x283   : > { %v1988_v4 = vadd.f32 %v3911_v6, %v1968_v44  ;;  %v1788_v19 = vadd.f32 %v1754_v38, %v1716_v13 }
 0x285   : > { %v2004_v37 = vmax.f32 %v1988_v4, 0.0  ;;  %v1870_v23 = vadd.f32 %v1836_v43, %v1788_v19  ;;  %v1721_v4 = vadd.f32 %v1694_v50, %v3862_v15 }
 0x286   : > { %v1917_v11 = vpop.f32.mrf.mxu0 }
 0x287   : > { %v1838_v33 = vpop.f32.mrf.mxu3  ;;  %v2018_v40 = vpack.c.bf16 %v2004_v37, %v2003_v30  ;;  %v1949_v58 = vadd.f32 %v1915_v8, %v1870_v23  ;;  %v1697_v8 = vpop.f32.mrf.mxu1 }
 0x289   : > { %2518 = vmatmul.msk.bf16.gmra.mxu1 %vm1184_vm5, %v2018_v40  ;;  %v1969_v41 = vmul.f32 %v3905_v32, %v1949_v58 }
 0x28a   : > { %v1756_v54 = vpop.f32.mrf.mxu2 }
 0x28b   : > { %v1789_v16 = vadd.f32 %v1756_v54, %v1717_v24  ;;  %v1989_v56 = vadd.f32 %v3911_v6, %v1969_v41  ;;  %v1722_v24 = vadd.f32 %v1697_v8, %v3867_v36 }
 0x28d   : > { %v1871_v52 = vadd.f32 %v1838_v33, %v1789_v16  ;;  %v2005_v55 = vmax.f32 %v1989_v56, 0.0 }
 0x28e   : > { %v1920_v51 = vpop.f32.mrf.mxu0 }
 0x28f   : > { %v1841_v46 = vpop.f32.mrf.mxu3  ;;  %v1950_v42 = vadd.f32 %v1917_v11, %v1871_v52  ;;  %v1699_v28 = vpop.f32.mrf.mxu1 }
 0x291   : > { %v1970_v10 = vmul.f32 %v3905_v32, %v1950_v42 }
 0x292   : > { %v1759_v3 = vpop.f32.mrf.mxu2 }
 0x293   : > { %v1990_v49 = vadd.f32 %v3911_v6, %v1970_v10  ;;  %v1790_v39 = vadd.f32 %v1759_v3, %v1718_v60  ;;  %v1723_v10 = vadd.f32 %v1699_v28, %v3877_v57 }
 0x295   : > { %v2006_v25 = vmax.f32 %v1990_v49, 0.0  ;;  %v1872_v27 = vadd.f32 %v1841_v46, %v1790_v39 }
 0x296   : > { %v1922_v53 = vpop.f32.mrf.mxu0 }
 0x297   : > { %v1843_v18 = vpop.f32.mrf.mxu3  ;;  %v2019_v61 = vpack.c.bf16 %v2006_v25, %v2005_v55  ;;  %v1951_v31 = vadd.f32 %v1920_v51, %v1872_v27  ;;  %v1702_v56 = vpop.f32.mrf.mxu1 }
 0x299   : > { %2519 = vmatmul.msk.bf16.gmra.mxu1 %vm1184_vm5, %v2019_v61  ;;  %v1971_v35 = vmul.f32 %v3905_v32, %v1951_v31 }
 0x29a   : > { %v1761_v48 = vpop.f32.mrf.mxu2 }
 0x29b   : > { %v1791_v5 = vadd.f32 %v1761_v48, %v1719_v21  ;;  %v1991_v63 = vadd.f32 %v3911_v6, %v1971_v35 }
 0x29d   : > { %v1873_v62 = vadd.f32 %v1843_v18, %v1791_v5  ;;  %v2007_v43 = vmax.f32 %v1991_v63, 0.0  ;;  %v1724_v18 = vadd.f32 %v1702_v56, %v3884_v1 }
 0x29e   : > { %v1925_v2 = vpop.f32.mrf.mxu0 }
 0x29f   : > { %v1846_v26 = vpop.f32.mrf.mxu3  ;;  %v1952_v0 = vadd.f32 %v1922_v53, %v1873_v62  ;;  %v1704_v31 = vpop.f32.mrf.mxu1 }
 0x2a1   : > { %v1972_v45 = vmul.f32 %v3905_v32, %v1952_v0  ;;  %v1725_v0 = vadd.f32 %v1704_v31, %v3891_v47 }
 0x2a2   : > { %v1764_v20 = vpop.f32.mrf.mxu2 }
 0x2a3   : > { %v1992_v12 = vadd.f32 %v3911_v6, %v1972_v45  ;;  %v1792_v7 = vadd.f32 %v1764_v20, %v1720_v29 }
 0x2a5   : > { %v2008_v9 = vmax.f32 %v1992_v12, 0.0  ;;  %v1874_v13 = vadd.f32 %v1846_v26, %v1792_v7 }
 0x2a6   : > { %v1927_v14 = vpop.f32.mrf.mxu0 }
 0x2a7   : > { %v1848_v44 = vpop.f32.mrf.mxu3  ;;  %v2020_v38 = vpack.c.bf16 %v2008_v9, %v2007_v43  ;;  %v1953_v19 = vadd.f32 %v1925_v2, %v1874_v13  ;;  %v1707_v20 = vpop.f32.mrf.mxu1 }
 0x2a8   : > { %v1726_v43 = vadd.f32 %v1707_v20, %v3895_v17 }
 0x2a9   : > { %2520 = vmatmul.msk.bf16.gmra.mxu1 %vm1184_vm5, %v2020_v38  ;;  %v1973_v37 = vmul.f32 %v3905_v32, %v1953_v19 }
 0x2aa   : > { %v1766_v22 = vpop.f32.mrf.mxu2 }
 0x2ab   : > { %v1793_v30 = vadd.f32 %v1766_v22, %v1721_v4  ;;  %v1993_v58 = vadd.f32 %v3911_v6, %v1973_v37 }
 0x2ad   : > { %v1875_v23 = vadd.f32 %v1848_v44, %v1793_v30  ;;  %v2009_v52 = vmax.f32 %v1993_v58, 0.0 }
 0x2ae   : > { %v1930_v11 = vpop.f32.mrf.mxu0 }
 0x2af   : > { %v1851_v33 = vpop.f32.mrf.mxu3  ;;  %v1954_v40 = vadd.f32 %v1927_v14, %v1875_v23  ;;  %v1709_v37 = vpop.f32.mrf.mxu1 }
 0x2b1   : > { %v1974_v54 = vmul.f32 %v3905_v32, %v1954_v40 }
 0x2b2   : > { %v1769_v16 = vpop.f32.mrf.mxu2 }
 0x2b3   : > { %v1994_v15 = vadd.f32 %v3911_v6, %v1974_v54  ;;  %v1794_v41 = vadd.f32 %v1769_v16, %v1722_v24 }
 0x2b5   : > { %v2010_v51 = vmax.f32 %v1994_v15, 0.0  ;;  %v1876_v46 = vadd.f32 %v1851_v33, %v1794_v41 }
 0x2b6   : > { %v1932_v42 = vpop.f32.mrf.mxu0 }
 0x2b7   : > { %v1853_v59 = vpop.f32.mrf.mxu3  ;;  %v2021_v60 = vpack.c.bf16 %v2010_v51, %v2009_v52  ;;  %v1955_v3 = vadd.f32 %v1930_v11, %v1876_v46  ;;  %v1727_v11 = vadd.f32 %v1709_v37, %v3898_v34 }
 0x2b9   : > { %2521 = vmatmul.msk.bf16.gmra.mxu1 %vm1184_vm5, %v2021_v60  ;;  %v1975_v39 = vmul.f32 %v3905_v32, %v1955_v3 }
 0x2ba   : > { %v1771_v36 = vpop.f32.mrf.mxu2 }
 0x2bb   : > { %v1795_v49 = vadd.f32 %v1771_v36, %v1723_v10  ;;  %v1995_v61 = vadd.f32 %v3911_v6, %v1975_v39 }
 0x2bd   : > { %v1877_v55 = vadd.f32 %v1853_v59, %v1795_v49  ;;  %v2011_v5 = vmax.f32 %v1995_v61, 0.0  ;;  %v2556_v59 = vld [vmem:[%s3968_s27] sm:$0xff]  }
 0x2be   : > { %v1935_v53 = vpop.f32.mrf.mxu0  ;;  %v2557_v60 = vunpack.c.l.bf16 %v2556_v59  ;;  %v2558_v39 = vunpack.c.h.bf16 %v2556_v59 }
 0x2bf   : > { %v1856_v25 = vpop.f32.mrf.mxu3  ;;  %v1956_v27 = vadd.f32 %v1932_v42, %v1877_v55  ;;  %v3973_v42 = vld [vmem:[%s4152_s13] ss:$0 sm:$0xff]  ;;  %s2799_s13 = sshra.s32 %s2245_s12, 4  ;;  %s2800_s13 = int_to_ptr.hbm [resolvable:$true] %s2799_s13 }
 0x2c0   : > { %s2801_s29 = scalar_lea.hbm %s2800_s13, 128  ;;  %p2806_p2 = scmp.lt.s32.totalorder %s2800_s13, %s4156_s7 }
 0x2c1   : > { %v1976_v21 = vmul.f32 %v3905_v32, %v1956_v27  ;;  %p2802_p1 = scmp.ne.s32.totalorder %s2800_s13, %s2801_s29  ;;  %p2807_p3 = scmp.lt.s32.totalorder %s2805_s11, %s2801_s29 }
 0x2c2   : > { %v1774_v50 = vpop.f32.mrf.mxu2 }
 0x2c3   : > { %v1996_v57 = vadd.f32 %v3911_v6, %v1976_v21  ;;  %v1796_v48 = vadd.f32 %v1774_v50, %v1724_v18  ;;  %p2803_p4 = pnand %p2802_p1, %p3046_p6  ;;  %p2808_p5 = por %p2807_p3, %p2806_p2 }
 0x2c5   : > { %v2012_v35 = vmax.f32 %v1996_v57, 0.0  ;;  %v1878_v62 = vadd.f32 %v1856_v25, %v1796_v48  ;;  %p2804_p0 = pneg %p2803_p4 }
 0x2c6   : > { %v1937_v1 = vpop.f32.mrf.mxu0 }
 0x2c7   : > { %v2022_v2 = vpack.c.bf16 %v2012_v35, %v2011_v5  ;;  %v1858_v26 = vpop.f32.mrf.mxu3  ;;  %v1957_v29 = vadd.f32 %v1935_v53, %v1878_v62  ;;  %v2587_v53 = vld [vmem:[%s3968_s27 + $0x8] sm:$0xff]   ;;  %p2809_p7 = pnand %p2808_p5, %p2804_p0 }
 0x2c8   : > { %v2561_v21 = vunpack.c.l.bf16 %v2587_v53  ;;  %v2562_v35 = vunpack.c.h.bf16 %v2587_v53 }
 0x2c9   : > { %2522 = vmatmul.msk.bf16.gmra.mxu1 %vm1184_vm5, %v2022_v2  ;;  %v1977_v12 = vmul.f32 %v3905_v32, %v1957_v29 }
 0x2ca   : > { %v1776_v63 = vpop.f32.mrf.mxu2 }
 0x2cb   : > { %v1797_v45 = vadd.f32 %v1776_v63, %v1725_v0  ;;  %v1997_v9 = vadd.f32 %v3911_v6, %v1977_v12  ;;  %v2588_v0 = vld [vmem:[%s3968_s27 + $0x10] sm:$0xff]  }
 0x2cc   : > { %v2565_v63 = vunpack.c.l.bf16 %v2588_v0 }
 0x2cd   : > { %v1879_v7 = vadd.f32 %v1858_v26, %v1797_v45  ;;  %v2013_v19 = vmax.f32 %v1997_v9, 0.0 }
 0x2ce   : > { %v1940_v4 = vpop.f32.mrf.mxu0 }
 0x2cf   : > { %v1958_v8 = vadd.f32 %v1937_v1, %v1879_v7  ;;  %v1861_v14 = vpop.f32.mrf.mxu3 }
 0x2d1   : > { %v1978_v13 = vmul.f32 %v3905_v32, %v1958_v8 }
 0x2d2   : > { %v1779_v44 = vpop.f32.mrf.mxu2 }
 0x2d3   : > { %v1998_v47 = vadd.f32 %v3911_v6, %v1978_v13  ;;  %v1798_v38 = vadd.f32 %v1779_v44, %v1726_v43  ;;  %v2566_v43 = vunpack.c.h.bf16 %v2588_v0  ;;  %v2589_v44 = vld [vmem:[%s3968_s27 + $0x18] sm:$0xff]  }
 0x2d5   : > { %v2014_v22 = vmax.f32 %v1998_v47, 0.0  ;;  %v1880_v30 = vadd.f32 %v1861_v14, %v1798_v38 }
 0x2d6   : > { %v1942_v54 = vpop.f32.mrf.mxu0 }
 0x2d7   : > { %v2023_v23 = vpack.c.bf16 %v2014_v22, %v2013_v19  ;;  %v1959_v28 = vadd.f32 %v1940_v4, %v1880_v30  ;;  %v1863_v40 = vpop.f32.mrf.mxu3  ;;  %v2569_v4 = vunpack.c.l.bf16 %v2589_v44 }
 0x2d9   : > { %2523 = vmatmul.msk.bf16.gmra.mxu1 %vm1184_vm5, %v2023_v23  ;;  %v1979_v24 = vmul.f32 %v3905_v32, %v1959_v28 }
 0x2da   : > { %v1781_v17 = vpop.f32.mrf.mxu2 }
 0x2db   : > { %v1799_v33 = vadd.f32 %v1781_v17, %v1727_v11  ;;  %v1999_v15 = vadd.f32 %v3911_v6, %v1979_v24  ;;  %v2570_v11 = vunpack.c.h.bf16 %v2589_v44 }
 0x2dd   : > { %v1881_v58 = vadd.f32 %v1863_v40, %v1799_v33  ;;  %v2015_v34 = vmax.f32 %v1999_v15, 0.0  ;;  %v2590_v40 = vld [vmem:[%s3968_s27 + $0x20] sm:$0xff]  }
 0x2df   : > { %v1960_v16 = vadd.f32 %v1942_v54, %v1881_v58  ;;  %v2573_v54 = vunpack.c.l.bf16 %v2590_v40 }
 0x2e1   : > { %v1980_v41 = vmul.f32 %v3905_v32, %v1960_v16  ;;  %v3979_v32 = vld [vmem:[%s4153_s25] ss:$0 sm:$0xff] }
 0x2e3   : > { %v2000_v52 = vadd.f32 %v3911_v6, %v1980_v41 }
 0x2e5   : > { %v2016_v51 = vmax.f32 %v2000_v52, 0.0 }
 0x2e7   : > { %v2024_v46 = vpack.c.bf16 %v2016_v51, %v2015_v34  ;;  %v2574_v51 = vunpack.c.h.bf16 %v2590_v40 }
 0x2e9   : > { %2524 = vmatmul.msk.bf16.gmra.mxu1 %vm1184_vm5, %v2024_v46 }
 0x2f6   : > { %v2062_v6 = vpop.f32.mrf.mxu1 }
 0x2f7   : > { %v2141_v56 = vmul.f32 %v3973_v42, %v2062_v6 }
 0x2f9   : > { %v2161_v10 = vadd.f32 %v3979_v32, %v2141_v56 }
 0x2fb   : > { %v2177_v3 = vadd.f32 %v2557_v60, %v2161_v10  ;;  %v2591_v60 = vld [vmem:[%s3968_s27 + $0x28] sm:$0xff]  }
 0x2fd   : > { %v2193_v36 = vmax.f32 %v2177_v3, 0.0  ;;  %v2577_v3 = vunpack.c.l.bf16 %v2591_v60 }
 0x2fe   : > { %v2064_v49 = vpop.f32.mrf.mxu1 }
 0x2ff   : > { %2210 = vst.msk [vmem:[%s3119_s6] sm:$0xff] %vm2209_vm8, %v2193_v36  ;;  %v2142_v55 = vmul.f32 %v3973_v42, %v2064_v49 }
 0x301   : > { %v2162_v25 = vadd.f32 %v3979_v32, %v2142_v55 }
 0x303   : > { %v2178_v27 = vadd.f32 %v2558_v39, %v2162_v25 }
 0x305   : > { %v2194_v18 = vmax.f32 %v2178_v27, 0.0  ;;  %v2578_v27 = vunpack.c.h.bf16 %v2591_v60 }
 0x306   : > { %v2067_v61 = vpop.f32.mrf.mxu1 }
 0x307   : > { %2211 = vst.msk [vmem:[%s3119_s6 + $0x8] sm:$0xff] %vm2209_vm8, %v2194_v18  ;;  %v2143_v31 = vmul.f32 %v3973_v42, %v2067_v61 }
 0x309   : > { %v2163_v50 = vadd.f32 %v3979_v32, %v2143_v31 }
 0x30b   : > { %v2179_v57 = vadd.f32 %v2561_v21, %v2163_v50  ;;  %v2592_v21 = vld [vmem:[%s3968_s27 + $0x30] sm:$0xff]  }
 0x30d   : > { %v2195_v48 = vmax.f32 %v2179_v57, 0.0  ;;  %v2581_v57 = vunpack.c.l.bf16 %v2592_v21 }
 0x30e   : > { %v2069_v5 = vpop.f32.mrf.mxu1 }
 0x30f   : > { %2212 = vst.msk [vmem:[%s3119_s6 + $0x10] sm:$0xff] %vm2209_vm8, %v2195_v48  ;;  %v2144_v62 = vmul.f32 %v3973_v42, %v2069_v5 }
 0x311   : > { %v2164_v2 = vadd.f32 %v3979_v32, %v2144_v62 }
 0x313   : > { %v2180_v26 = vadd.f32 %v2562_v35, %v2164_v2 }
 0x315   : > { %v2196_v29 = vmax.f32 %v2180_v26, 0.0  ;;  %v2582_v26 = vunpack.c.h.bf16 %v2592_v21 }
 0x316   : > { %v2072_v1 = vpop.f32.mrf.mxu1 }
 0x317   : > { %2213 = vst.msk [vmem:[%s3119_s6 + $0x18] sm:$0xff] %vm2209_vm8, %v2196_v29  ;;  %v2145_v45 = vmul.f32 %v3973_v42, %v2072_v1 }
 0x319   : > { %v2165_v20 = vadd.f32 %v3979_v32, %v2145_v45 }
 0x31b   : > { %v2181_v12 = vadd.f32 %v2565_v63, %v2165_v20  ;;  %v2593_v63 = vld [vmem:[%s3968_s27 + $0x38] sm:$0xff]   ;;  %s2242_s27 = sshll.u32 %s3119_s6, 4  ;;  %s2243_s27 = int_to_ptr.vmem [resolvable:$true] %s2242_s27 }
 0x31d   : > { %v2197_v7 = vmax.f32 %v2181_v12, 0.0  ;;  %v2585_v12 = vunpack.c.l.bf16 %v2593_v63 }
 0x31e   : > { %v2074_v8 = vpop.f32.mrf.mxu1 }
 0x31f   : > { %2214 = vst.msk [vmem:[%s3119_s6 + $0x20] sm:$0xff] %vm2209_vm8, %v2197_v7  ;;  %v2146_v9 = vmul.f32 %v3973_v42, %v2074_v8 }
 0x321   : > { %v2166_v13 = vadd.f32 %v3979_v32, %v2146_v9 }
 0x323   : > { %v2182_v14 = vadd.f32 %v2566_v43, %v2166_v13 }
 0x325   : > { %v2198_v47 = vmax.f32 %v2182_v14, 0.0  ;;  %v2586_v14 = vunpack.c.h.bf16 %v2593_v63 }
 0x326   : > { %v2077_v38 = vpop.f32.mrf.mxu1 }
 0x327   : > { %2215 = vst.msk [vmem:[%s3119_s6 + $0x28] sm:$0xff] %vm2209_vm8, %v2198_v47  ;;  %v2147_v19 = vmul.f32 %v3973_v42, %v2077_v38 }
 0x329   : > { %v2167_v22 = vadd.f32 %v3979_v32, %v2147_v19 }
 0x32b   : > { %v2183_v30 = vadd.f32 %v2569_v4, %v2167_v22 }
 0x32d   : > { %v2199_v37 = vmax.f32 %v2183_v30, 0.0 }
 0x32e   : > { %v2079_v23 = vpop.f32.mrf.mxu1 }
 0x32f   : > { %2216 = vst.msk [vmem:[%s3119_s6 + $0x30] sm:$0xff] %vm2209_vm8, %v2199_v37  ;;  %v2148_v28 = vmul.f32 %v3973_v42, %v2079_v23 }
 0x331   : > { %v2168_v17 = vadd.f32 %v3979_v32, %v2148_v28 }
 0x333   : > { %v2184_v33 = vadd.f32 %v2570_v11, %v2168_v17 }
 0x335   : > { %v2200_v24 = vmax.f32 %v2184_v33, 0.0 }
 0x336   : > { %v2082_v58 = vpop.f32.mrf.mxu1 }
 0x337   : > { %2217 = vst.msk [vmem:[%s3119_s6 + $0x38] sm:$0xff] %vm2209_vm8, %v2200_v24  ;;  %v2149_v16 = vmul.f32 %v3973_v42, %v2082_v58 }
 0x339   : > { %v2169_v15 = vadd.f32 %v3979_v32, %v2149_v16 }
 0x33b   : > { %v2185_v41 = vadd.f32 %v2573_v54, %v2169_v15 }
 0x33d   : > { %v2201_v52 = vmax.f32 %v2185_v41, 0.0 }
 0x33e   : > { %v2084_v34 = vpop.f32.mrf.mxu1 }
 0x33f   : > { %2218 = vst.msk [vmem:[%s3119_s6 + $0x40] sm:$0xff] %vm2209_vm8, %v2201_v52  ;;  %v2150_v46 = vmul.f32 %v3973_v42, %v2084_v34 }
 0x341   : > { %v2170_v59 = vadd.f32 %v3979_v32, %v2150_v46 }
 0x343   : > { %v2186_v6 = vadd.f32 %v2574_v51, %v2170_v59 }
 0x345   : > { %v2202_v56 = vmax.f32 %v2186_v6, 0.0 }
 0x346   : > { %v2087_v10 = vpop.f32.mrf.mxu1 }
 0x347   : > { %2219 = vst.msk [vmem:[%s3119_s6 + $0x48] sm:$0xff] %vm2209_vm8, %v2202_v56  ;;  %v2151_v36 = vmul.f32 %v3973_v42, %v2087_v10 }
 0x349   : > { %v2171_v49 = vadd.f32 %v3979_v32, %v2151_v36 }
 0x34b   : > { %v2187_v39 = vadd.f32 %v2577_v3, %v2171_v49 }
 0x34d   : > { %v2203_v55 = vmax.f32 %v2187_v39, 0.0 }
 0x34e   : > { %v2089_v25 = vpop.f32.mrf.mxu1 }
 0x34f   : > { %2220 = vst.msk [vmem:[%s3119_s6 + $0x50] sm:$0xff] %vm2209_vm8, %v2203_v55  ;;  %v2152_v53 = vmul.f32 %v3973_v42, %v2089_v25 }
 0x351   : > { %v2172_v18 = vadd.f32 %v3979_v32, %v2152_v53 }
 0x353   : > { %v2188_v61 = vadd.f32 %v2578_v27, %v2172_v18 }
 0x355   : > { %v2204_v31 = vmax.f32 %v2188_v61, 0.0 }
 0x356   : > { %v2092_v50 = vpop.f32.mrf.mxu1 }
 0x357   : > { %2221 = vst.msk [vmem:[%s3119_s6 + $0x58] sm:$0xff] %vm2209_vm8, %v2204_v31  ;;  %v2153_v48 = vmul.f32 %v3973_v42, %v2092_v50 }
 0x359   : > { %v2173_v5 = vadd.f32 %v3979_v32, %v2153_v48 }
 0x35b   : > { %v2189_v35 = vadd.f32 %v2581_v57, %v2173_v5 }
 0x35d   : > { %v2205_v62 = vmax.f32 %v2189_v35, 0.0 }
 0x35e   : > { %v2094_v2 = vpop.f32.mrf.mxu1 }
 0x35f   : > { %2222 = vst.msk [vmem:[%s3119_s6 + $0x60] sm:$0xff] %vm2209_vm8, %v2205_v62  ;;  %v2154_v0 = vmul.f32 %v3973_v42, %v2094_v2 }
 0x361   : > { %v2174_v29 = vadd.f32 %v3979_v32, %v2154_v0 }
 0x363   : > { %v2190_v1 = vadd.f32 %v2582_v26, %v2174_v29 }
 0x365   : > { %v2206_v45 = vmax.f32 %v2190_v1, 0.0 }
 0x366   : > { %v2097_v20 = vpop.f32.mrf.mxu1 }
 0x367   : > { %2223 = vst.msk [vmem:[%s3119_s6 + $0x68] sm:$0xff] %vm2209_vm8, %v2206_v45  ;;  %v2155_v7 = vmul.f32 %v3973_v42, %v2097_v20 }
 0x369   : > { %v2175_v8 = vadd.f32 %v3979_v32, %v2155_v7 }
 0x36b   : > { %v2191_v43 = vadd.f32 %v2585_v12, %v2175_v8 }
 0x36d   : > { %v2207_v9 = vmax.f32 %v2191_v43, 0.0 }
 0x36e   : > { %v2099_v13 = vpop.f32.mrf.mxu1 }
 0x36f   : > { %2224 = vst.msk [vmem:[%s3119_s6 + $0x70] sm:$0xff] %vm2209_vm8, %v2207_v9  ;;  %v2156_v44 = vmul.f32 %v3973_v42, %v2099_v13 }
 0x371   : > { %v2176_v47 = vadd.f32 %v3979_v32, %v2156_v44 }
 0x373   : > { %v2192_v38 = vadd.f32 %v2586_v14, %v2176_v47 }
 0x375   : > { %v2208_v4 = vmax.f32 %v2192_v38, 0.0 }
 0x377   : > { %2225 = vst.msk [vmem:[%s3119_s6 + $0x78] sm:$0xff] %vm2209_vm8, %v2208_v4 }
 0x378   : > { %2812 = shalt.err (!%p2809_p7)
}
 0x379   : > { %s2919_s3 = smov 128   ;;  %s2920_s6 = smov 8  }
 0x37a   : > { %2605 = dma.vmem_to_hbm [thread:$0]  (%p3046_p6), %s2243_s27, 2048, %s2245_s12, %s2227_s24, %s2919_s3, %s2919_s3, %s2920_s6  }
 0x37b PF: > { %s4158_s2 = sld [smem:[#allocation12_spill]]  ;;  %p2622_p8 = scmp.ge.s32.totalorder %s2911_s23, 2 }
 0x37d   : > { %p2616_p9 = pnand %p2622_p8, %p3052_p10 }
 0x37f   : > { %p2617_p12 = pneg %p2616_p9 }
 0x381   : > { %s2259_s20 = sand.u32 1, %s4158_s2  }
 0x382   : > { %s2260_s5 = scalar_lea.sflag [#allocation5], %s2259_s20 }
 0x383   : > { %2866 = dma.done.wait (%p2617_p12), %s2260_s5, 2048  }
 0x384   : > { %2868 = vsyncadd (%p2617_p12), %s2260_s5, 4294965248  ;;  %s27_s23 = sadd.s32 1, %s2911_s23   ;;  %s4160_s19 = sld [smem:[#allocation14_spill]] }
 0x385   : > { %p24_p13 = scmp.ge.s32.totalorder %s27_s23, 6   ;;  %s4161_s21 = sld [smem:[#allocation17_spill]] }
 0x386   : > { %s4162_s30 = sld [smem:[#allocation18_spill]]  ;;  %s4163_s13 = smov %s2875_s14 }
 0x387   : > { %s4164_s14 = smov %s2879_s15  ;;  %s4165_s15 = smov %s3094_s8 }
 0x388   : > { %s4166_s16 = smov %s2887_s17  ;;  %s4167_s17 = smov %s2891_s18 }
 0x389   : > { %s4168_s18 = smov %s3091_s9  ;;  %s4169_s20 = smov %s2907_s22 }
 0x38a   :  { %26 = sbr.rel (!%p24_p13) target bundleno = 19 (0x13), region = 116 }
 0x38c   : > { %s4170_s22 = smov %s4162_s30 }
 0x38f   :  { %2266 = vsyncpa [#allocation4], 1 }
 0x390   :  { %2268 = vsyncpa [#allocation4 + $0x1], 1 }
 0x391   :  { %2269 = vsyncpa [#allocation7], 1 }
 0x392   :  { %2270 = vsyncpa [#allocation5], 1 }
 0x393   :  { %2272 = vsyncpa [#allocation5 + $0x1], 1 }

</bundles_post_ra>
